<compile_context>
chip_gen: v7x
topology: tpu7x:2x2x1
jax: 0.10.0
libtpu: 0.0.40
codegen_flags: <defaults>
</compile_context>

<pallas_src>
import functools

import jax
import jax.numpy as jnp
from jax.experimental import pallas as pl
from jax.experimental.pallas import tpu as pltpu

_BN_EPS = 1e-5


# --------------------------------------------------------------------------
# Fused bottleneck kernel (one grid step = one (image, row-tile))
# --------------------------------------------------------------------------
def _bottleneck_kernel(x_main_ref, x_top_ref, x_bot_ref,
                       w0_ref, w1_ref, w2_ref,
                       shift0_ref, shift1_ref, shift2_ref,
                       *rest, th, wo, cin, cmid_p, cout_p, rt, use_ext):
    if use_ext:
        wext_ref, bext_ref, out_ref, hcat_ref = rest
    else:
        out_ref, hcat_ref = rest

    t = pl.program_id(1)
    cdt = hcat_ref.dtype                       # compute/streaming dtype
    nrows = (th + 2) * wo                      # halo rows included

    # ---- conv0 (1x1) + bn0 (folded) + relu on [top; main; bot] in ONE dot.
    x_main = x_main_ref[...]                                   # (th*wo, cin)
    x_all = jnp.concatenate([x_top_ref[...], x_main, x_bot_ref[...]], axis=0)
    h0 = jnp.dot(x_all, w0_ref[...], preferred_element_type=jnp.float32)
    h0 = jnp.maximum(h0 + shift0_ref[...], 0.0)                # (nrows, cmid_p)

    # conv1's zero padding along H: zero halo rows at the image boundaries.
    row = jax.lax.broadcasted_iota(jnp.int32, (nrows, 1), 0)
    valid = jnp.logical_and(jnp.logical_or(row >= wo, t > 0),
                            jnp.logical_or(row < (th + 1) * wo, t < rt - 1))
    h0 = jnp.where(valid, h0, 0.0)

    # conv1's zero padding along W: dx = -1 / +1 copies via sublane roll
    # (XLU) + per-column mask (VPU).  The roll wraps across image rows, but
    # every wrapped position is exactly a masked (x==0 / x==wo-1) position.
    col = row % wo
    h_left = jnp.where(col > 0, pltpu.roll(h0, 1, axis=0), 0.0)
    h_right = jnp.where(col < wo - 1, pltpu.roll(h0, nrows - 1, axis=0), 0.0)

    # Channel-concatenated h0 slab in VMEM; all stores lane/sublane aligned,
    # every element rewritten each step (no zero-fill needed).
    hcat_ref[:, 0 * cmid_p:1 * cmid_p] = h_left.astype(cdt)
    hcat_ref[:, 1 * cmid_p:2 * cmid_p] = h0.astype(cdt)
    hcat_ref[:, 2 * cmid_p:3 * cmid_p] = h_right.astype(cdt)

    # ---- conv1 (3x3, pad 1) + bn0 + relu: 3 dots with K = 3*cmid_p over
    # sublane-aligned row slices (dy*wo is a multiple of 8).
    acc1 = jnp.zeros((th * wo, cmid_p), jnp.float32)
    for dy in range(3):
        a = hcat_ref[dy * wo:(dy + th) * wo, :]
        acc1 = acc1 + jnp.dot(a, w1_ref[dy],
                              preferred_element_type=jnp.float32)
    h1 = jnp.maximum(acc1 + shift1_ref[...], 0.0).astype(cdt)

    # ---- conv2 (1x1) + bn1 + residual + relu.
    acc2 = jnp.dot(h1, w2_ref[...], preferred_element_type=jnp.float32)
    if use_ext:
        res = jnp.dot(x_main, wext_ref[...],
                      preferred_element_type=jnp.float32) + bext_ref[...]
    else:
        # cin == cout_p: lane-aligned identity residual is a free VPU add.
        res = x_main.astype(jnp.float32)
    y = jnp.maximum(acc2 + shift2_ref[...] + res, 0.0)
    out_ref[...] = y.astype(out_ref.dtype)


# --------------------------------------------------------------------------
# Host-side wrapper: weight folding, lane padding, tiling, pallas_call
# --------------------------------------------------------------------------
def _round_up(v, m):
    return (v + m - 1) // m * m


def _pick_row_tile(n, ho, wo, target_rows=512, min_steps=8):
    """Largest divisor of ho with <= target_rows matmul rows per step while
    keeping at least min_steps grid steps (megacore balance on v7x)."""
    cap_steps = min(min_steps, n * ho)
    best = 1
    for d in range(1, ho + 1):
        if ho % d == 0 and d * wo <= target_rows and n * (ho // d) >= cap_steps:
            best = max(best, d)
    return best


def bottleneck_forward(x_nchw, p, stride=1, first_in=False,
                       compute_dtype=jnp.bfloat16, row_tile=None,
                       out_dtype=None):
    out_dtype = x_nchw.dtype if out_dtype is None else out_dtype
    x = jnp.transpose(x_nchw, (0, 2, 3, 1))          # NCHW -> NHWC
    if stride > 1:
        x = x[:, ::stride, ::stride, :]              # 1x1-conv stride sampling
    n, ho, wo, cin = x.shape
    assert wo % 8 == 0, "fused kernel expects feature-map width % 8 == 0"

    cmid = p["conv0_w"].shape[0]
    cout = p["conv2_w"].shape[0]
    cmid_p = _round_up(cmid, 128)                    # lane-dense matmul outputs
    cout_p = _round_up(cout, 128)

    s0 = p["bn0_gamma"] / jnp.sqrt(p["bn0_var"] + _BN_EPS)
    s1 = p["bn1_gamma"] / jnp.sqrt(p["bn1_var"] + _BN_EPS)

    def pad_cols(a, cols):
        return jnp.pad(a, ((0, 0), (0, cols - a.shape[1])))

    def shift_vec(v, cols):
        return jnp.pad(v, (0, cols - v.shape[0])).reshape(1, cols).astype(jnp.float32)

    # conv0 (1x1): fold bn0 scale into weight columns, bias+bn into shift.
    w0 = pad_cols(p["conv0_w"].reshape(cmid, cin).T * s0[None, :], cmid_p)
    shift0 = shift_vec((p["conv0_b"] - p["bn0_mean"]) * s0 + p["bn0_beta"], cmid_p)

    # conv1 (3x3): the module reuses bn0 after conv1 -> fold s0 again.
    # Layout: (3, 3*cmid_p, cmid_p) so conv1 is 3 dots (dy) with K = 3*cmid_p;
    # the K blocks are ordered [dx=0 (left), dx=1 (center), dx=2 (right)].
    w1t = jnp.transpose(p["conv1_w"], (2, 3, 1, 0)) * s0[None, None, None, :]
    w1t = jnp.pad(w1t, ((0, 0), (0, 0), (0, cmid_p - cmid), (0, cmid_p - cmid)))
    w1 = w1t.reshape(3, 3 * cmid_p, cmid_p)
    shift1 = shift_vec((p["conv1_b"] - p["bn0_mean"]) * s0 + p["bn0_beta"], cmid_p)

    # conv2 (1x1) + bn1.
    w2 = jnp.pad(p["conv2_w"].reshape(cout, cmid).T * s1[None, :],
                 ((0, cmid_p - cmid), (0, cout_p - cout)))
    shift2 = shift_vec((p["conv2_b"] - p["bn1_mean"]) * s1 + p["bn1_beta"], cout_p)

    # Residual branch: conv_extend (first_in), direct VPU add (lane-aligned
    # identity), or identity matmul fallback (tiny non-aligned channels).
    if first_in:
        use_ext = True
        wext = pad_cols(p["convext_w"].reshape(cout, cin).T, cout_p)
        bext = shift_vec(p["convext_b"], cout_p)
    else:
        assert cin == cout, "non-first_in residual requires in_channel == out_channel"
        use_ext = (cin != cout_p)
        if use_ext:
            wext = pad_cols(jnp.eye(cin, dtype=jnp.float32), cout_p)
            bext = shift_vec(jnp.zeros((cout,), jnp.float32), cout_p)
        else:
            wext = bext = None

    # Row tiling: TH output rows per grid step.
    th = row_tile if row_tile is not None else _pick_row_tile(n, ho, wo)
    assert ho % th == 0
    rt = ho // th

    xs2d = x.reshape(n * ho * wo, cin).astype(compute_dtype)
    w0 = w0.astype(compute_dtype)
    w1 = w1.astype(compute_dtype)
    w2 = w2.astype(compute_dtype)
    if use_ext:
        wext = wext.astype(compute_dtype)

    kernel = functools.partial(_bottleneck_kernel, th=th, wo=wo, cin=cin,
                               cmid_p=cmid_p, cout_p=cout_p, rt=rt,
                               use_ext=use_ext)

    m_rows = n * ho * wo
    cbytes = jnp.dtype(compute_dtype).itemsize
    obytes = jnp.dtype(out_dtype).itemsize
    w_elems = (cin * cmid_p + 9 * cmid_p * cmid_p + cmid_p * cout_p
               + (cin * cout_p if use_ext else 0))
    flops = 2 * m_rows * w_elems
    bytes_accessed = (m_rows * cin * cbytes + m_rows * cout_p * obytes
                      + w_elems * cbytes)

    # VMEM budget: 2x double-buffered tiles + weights + the hcat scratch.
    tile_in = (th + 2) * wo * cin * cbytes
    tile_out = th * wo * cout_p * obytes
    shifts = (2 * cmid_p + (2 if use_ext else 1) * cout_p) * 4
    scratch = (th + 2) * wo * 3 * cmid_p * cbytes
    est = 2 * (tile_in + tile_out) + 2 * (w_elems * cbytes + shifts) + scratch
    vmem_limit = int(min(max(2 * est, 32 << 20), 48 << 20))

    in_specs = [
        # main TH-row tile of the (strided) input
        pl.BlockSpec((th * wo, cin), lambda i, t: (i * rt + t, 0)),
        # 1-row top / bottom halos of the SAME array (clamped indices;
        # out-of-image rows are zeroed inside the kernel)
        pl.BlockSpec((wo, cin),
                     lambda i, t: (i * ho + jnp.maximum(t * th - 1, 0), 0)),
        pl.BlockSpec((wo, cin),
                     lambda i, t: (i * ho + jnp.minimum((t + 1) * th, ho - 1), 0)),
        # folded weights (resident across the grid)
        pl.BlockSpec((cin, cmid_p), lambda i, t: (0, 0)),
        pl.BlockSpec((3, 3 * cmid_p, cmid_p), lambda i, t: (0, 0, 0)),
        pl.BlockSpec((cmid_p, cout_p), lambda i, t: (0, 0)),
        # per-channel shifts (f32)
        pl.BlockSpec((1, cmid_p), lambda i, t: (0, 0)),
        pl.BlockSpec((1, cmid_p), lambda i, t: (0, 0)),
        pl.BlockSpec((1, cout_p), lambda i, t: (0, 0)),
    ]
    args = [xs2d, xs2d, xs2d, w0, w1, w2, shift0, shift1, shift2]
    if use_ext:
        in_specs += [pl.BlockSpec((cin, cout_p), lambda i, t: (0, 0)),
                     pl.BlockSpec((1, cout_p), lambda i, t: (0, 0))]
        args += [wext, bext]

    out2d = pl.pallas_call(
        kernel,
        out_shape=jax.ShapeDtypeStruct((m_rows, cout_p), out_dtype),
        grid_spec=pltpu.PrefetchScalarGridSpec(
            num_scalar_prefetch=0,
            grid=(n, rt),
            in_specs=in_specs,
            out_specs=pl.BlockSpec((th * wo, cout_p), lambda i, t: (i * rt + t, 0)),
            scratch_shapes=[pltpu.VMEM(((th + 2) * wo, 3 * cmid_p), compute_dtype)],
        ),
        compiler_params=pltpu.CompilerParams(
            dimension_semantics=("parallel", "parallel"),
            vmem_limit_bytes=vmem_limit),
        cost_estimate=pl.CostEstimate(flops=flops, transcendentals=0,
                                      bytes_accessed=bytes_accessed),
    )(*args)

    out = out2d.reshape(n, ho, wo, cout_p)[..., :cout]
    return jnp.transpose(out, (0, 3, 1, 2))          # NHWC -> NCHW


# --------------------------------------------------------------------------
# Deterministic parameter init (shapes follow the PyTorch module)
# --------------------------------------------------------------------------
def init_params(key, in_channel, out_channel):
    mid = out_channel // 4
    ks = jax.random.split(key, 16)
    nrm = lambda k, shape: 0.1 * jax.random.normal(k, shape, jnp.float32)
    return {
        "conv0_w": nrm(ks[0], (mid, in_channel, 1, 1)),
        "conv0_b": nrm(ks[1], (mid,)),
        "conv1_w": nrm(ks[2], (mid, mid, 3, 3)),
        "conv1_b": nrm(ks[3], (mid,)),
        "conv2_w": nrm(ks[4], (out_channel, mid, 1, 1)),
        "conv2_b": nrm(ks[5], (out_channel,)),
        "convext_w": nrm(ks[6], (out_channel, in_channel, 1, 1)),
        "convext_b": nrm(ks[7], (out_channel,)),
        "bn0_gamma": 1.0 + nrm(ks[8], (mid,)),
        "bn0_beta": nrm(ks[9], (mid,)),
        "bn0_mean": nrm(ks[10], (mid,)),
        "bn0_var": 1.0 + jnp.abs(nrm(ks[11], (mid,))),
        "bn1_gamma": 1.0 + nrm(ks[12], (out_channel,)),
        "bn1_beta": nrm(ks[13], (out_channel,)),
        "bn1_mean": nrm(ks[14], (out_channel,)),
        "bn1_var": 1.0 + jnp.abs(nrm(ks[15], (out_channel,))),
    }


# --------------------------------------------------------------------------
# Pure-JAX reference (mirrors the PyTorch forward, eval-mode BN)
# --------------------------------------------------------------------------
def bottleneck_ref(x, p, stride=1, first_in=False):
    def conv(x, w, b, stride=1, pad=0):
        y = jax.lax.conv_general_dilated(
            x, w, (stride, stride), [(pad, pad), (pad, pad)],
            dimension_numbers=("NCHW", "OIHW", "NCHW"))
        return y + b.reshape(1, -1, 1, 1)

    def bn(x, g, be, m, v):
        r = lambda a: a.reshape(1, -1, 1, 1)
        return (x - r(m)) / jnp.sqrt(r(v) + _BN_EPS) * r(g) + r(be)

    x0 = jax.nn.relu(bn(conv(x, p["conv0_w"], p["conv0_b"], stride),
                        p["bn0_gamma"], p["bn0_beta"], p["bn0_mean"], p["bn0_var"]))
    x0 = jax.nn.relu(bn(conv(x0, p["conv1_w"], p["conv1_b"], 1, 1),
                        p["bn0_gamma"], p["bn0_beta"], p["bn0_mean"], p["bn0_var"]))
    x0 = bn(conv(x0, p["conv2_w"], p["conv2_b"]),
            p["bn1_gamma"], p["bn1_beta"], p["bn1_mean"], p["bn1_var"])
    xr = conv(x, p["convext_w"], p["convext_b"], stride) if first_in else x
    return jax.nn.relu(xr + x0)


if __name__ == "__main__":
    key = jax.random.PRNGKey(0)

    # --- config 1: first_in block (conv_extend residual) -------------------
    params = init_params(key, 4, 16)
    x = jax.random.normal(jax.random.fold_in(key, 99), (2, 4, 16, 16), jnp.float32)
    ref = bottleneck_ref(x, params, stride=1, first_in=True)

    # f32 path: tight check of the fused-kernel math.
    fwd_f32 = jax.jit(functools.partial(bottleneck_forward, stride=1,
                                        first_in=True, compute_dtype=jnp.float32))
    out_f32 = jax.block_until_ready(fwd_f32(x, params))
    assert out_f32.shape == (2, 16, 16, 16), out_f32.shape
    assert jnp.allclose(out_f32, ref, rtol=2e-3, atol=2e-3), \
        float(jnp.max(jnp.abs(out_f32 - ref)))

    # bf16 path (default / fast): looser tolerance due to bf16 operands.
    fwd_bf16 = jax.jit(functools.partial(bottleneck_forward, stride=1, first_in=True))
    out_bf16 = jax.block_until_ready(fwd_bf16(x, params))
    assert out_bf16.shape == (2, 16, 16, 16), out_bf16.shape
    assert jnp.allclose(out_bf16, ref, rtol=5e-2, atol=5e-2), \
        float(jnp.max(jnp.abs(out_bf16 - ref)))

    # --- config 2: non-first_in, lane-aligned channels (VPU residual add) ---
    params2 = init_params(jax.random.fold_in(key, 7), 128, 128)
    x2 = jax.random.normal(jax.random.fold_in(key, 123), (2, 128, 16, 16), jnp.float32)
    ref2 = bottleneck_ref(x2, params2, stride=1, first_in=False)
    fwd2 = jax.jit(functools.partial(bottleneck_forward, stride=1, first_in=False))
    out2 = jax.block_until_ready(fwd2(x2, params2))
    assert out2.shape == (2, 128, 16, 16), out2.shape
    assert jnp.allclose(out2, ref2, rtol=5e-2, atol=5e-2), \
        float(jnp.max(jnp.abs(out2 - ref2)))

    # --- config 3: non-first_in, small channels (identity-matmul fallback) --
    params3 = init_params(jax.random.fold_in(key, 11), 16, 16)
    x3 = jax.random.normal(jax.random.fold_in(key, 321), (2, 16, 16, 16), jnp.float32)
    ref3 = bottleneck_ref(x3, params3, stride=1, first_in=False)
    fwd3 = jax.jit(functools.partial(bottleneck_forward, stride=1, first_in=False))
    out3 = jax.block_until_ready(fwd3(x3, params3))
    assert out3.shape == (2, 16, 16, 16), out3.shape
    assert jnp.allclose(out3, ref3, rtol=5e-2, atol=5e-2), \
        float(jnp.max(jnp.abs(out3 - ref3)))

    print("KERNEL_OK")
</pallas_src>

<mosaic_0001>
module attributes {stable_mosaic.version = 11 : i64} {
  func.func @_bottleneck_kernel(%arg0: i32, %arg1: i32, %arg2: memref<64x4xf32, #tpu.memory_space<vmem>>, %arg3: memref<16x4xf32, #tpu.memory_space<vmem>>, %arg4: memref<16x4xf32, #tpu.memory_space<vmem>>, %arg5: memref<4x128xf32, #tpu.memory_space<vmem>>, %arg6: memref<3x384x128xf32, #tpu.memory_space<vmem>>, %arg7: memref<128x128xf32, #tpu.memory_space<vmem>>, %arg8: memref<1x128xf32, #tpu.memory_space<vmem>>, %arg9: memref<1x128xf32, #tpu.memory_space<vmem>>, %arg10: memref<1x128xf32, #tpu.memory_space<vmem>>, %arg11: memref<4x128xf32, #tpu.memory_space<vmem>>, %arg12: memref<1x128xf32, #tpu.memory_space<vmem>>, %arg13: memref<64x128xf32, #tpu.memory_space<vmem>>, %arg14: memref<96x384xf32, #tpu.memory_space<vmem>>) attributes {dimension_semantics = [#tpu.dimension_semantics<parallel>, #tpu.dimension_semantics<parallel>], iteration_bounds = array<i64: 2, 4>, scalar_prefetch = 0 : i64, scratch_operands = 1 : i64, tpu.core_type = #tpu.core_type<tc>, window_params = [{transform_indices = @transform_0, window_bounds = array<i64: 64, 4>}, {transform_indices = @transform_1, window_bounds = array<i64: 16, 4>}, {transform_indices = @transform_2, window_bounds = array<i64: 16, 4>}, {pipeline_mode = #tpu.pipeline_mode<synchronous>, transform_indices = @transform_3, window_bounds = array<i64: 4, 128>}, {pipeline_mode = #tpu.pipeline_mode<synchronous>, transform_indices = @transform_4, window_bounds = array<i64: 3, 384, 128>}, {pipeline_mode = #tpu.pipeline_mode<synchronous>, transform_indices = @transform_5, window_bounds = array<i64: 128, 128>}, {pipeline_mode = #tpu.pipeline_mode<synchronous>, transform_indices = @transform_6, window_bounds = array<i64: 1, 128>}, {pipeline_mode = #tpu.pipeline_mode<synchronous>, transform_indices = @transform_7, window_bounds = array<i64: 1, 128>}, {pipeline_mode = #tpu.pipeline_mode<synchronous>, transform_indices = @transform_8, window_bounds = array<i64: 1, 128>}, {pipeline_mode = #tpu.pipeline_mode<synchronous>, transform_indices = @transform_9, window_bounds = array<i64: 4, 128>}, {pipeline_mode = #tpu.pipeline_mode<synchronous>, transform_indices = @transform_10, window_bounds = array<i64: 1, 128>}, {transform_indices = @transform_11, window_bounds = array<i64: 64, 128>}]} {
    %c0 = arith.constant 0 : index
    %c0_0 = arith.constant 0 : index
    %0 = vector.load %arg2[%c0, %c0_0] : memref<64x4xf32, #tpu.memory_space<vmem>>, vector<64x4xf32>
    %c0_1 = arith.constant 0 : index
    %c0_2 = arith.constant 0 : index
    %1 = vector.load %arg3[%c0_1, %c0_2] : memref<16x4xf32, #tpu.memory_space<vmem>>, vector<16x4xf32>
    %c0_3 = arith.constant 0 : index
    %c0_4 = arith.constant 0 : index
    %2 = vector.load %arg4[%c0_3, %c0_4] : memref<16x4xf32, #tpu.memory_space<vmem>>, vector<16x4xf32>
    %3 = tpu.concatenate %1, %0, %2 in 0 : vector<16x4xf32>, vector<64x4xf32>, vector<16x4xf32> -> vector<96x4xf32>
    %c0_5 = arith.constant 0 : index
    %c0_6 = arith.constant 0 : index
    %4 = vector.load %arg5[%c0_5, %c0_6] : memref<4x128xf32, #tpu.memory_space<vmem>>, vector<4x128xf32>
    %cst = arith.constant dense<0.000000e+00> : vector<96x128xf32>
    %5 = tpu.matmul %3, %4, %cst {dimension_numbers = #tpu.dot_dimension_numbers<[1], [0], [0], [1], [0, 0, 1, 1], [], []>} : vector<96x4xf32>, vector<4x128xf32>, vector<96x128xf32> -> vector<96x128xf32>
    %c0_7 = arith.constant 0 : index
    %c0_8 = arith.constant 0 : index
    %6 = vector.load %arg8[%c0_7, %c0_8] : memref<1x128xf32, #tpu.memory_space<vmem>>, vector<1x128xf32>
    %7 = vector.broadcast %6 : vector<1x128xf32> to vector<96x128xf32>
    %8 = arith.addf %5, %7 : vector<96x128xf32>
    %cst_9 = arith.constant 0.000000e+00 : f32
    %9 = vector.broadcast %cst_9 : f32 to vector<96x128xf32>
    %10 = arith.maximumf %8, %9 : vector<96x128xf32>
    %11 = tpu.iota {dimensions = array<i32: 0>} : vector<96x1xi32>
    %c16_i32 = arith.constant 16 : i32
    %12 = vector.broadcast %c16_i32 : i32 to vector<96x1xi32>
    %13 = arith.cmpi sge, %11, %12 : vector<96x1xi32>
    %c0_i32 = arith.constant 0 : i32
    %14 = arith.cmpi sgt, %arg1, %c0_i32 : i32
    %15 = vector.broadcast %14 : i1 to vector<96x1xi1>
    %16 = arith.ori %13, %15 : vector<96x1xi1>
    %c80_i32 = arith.constant 80 : i32
    %17 = vector.broadcast %c80_i32 : i32 to vector<96x1xi32>
    %18 = arith.cmpi slt, %11, %17 : vector<96x1xi32>
    %c3_i32 = arith.constant 3 : i32
    %19 = arith.cmpi slt, %arg1, %c3_i32 : i32
    %20 = vector.broadcast %19 : i1 to vector<96x1xi1>
    %21 = arith.ori %18, %20 : vector<96x1xi1>
    %22 = arith.andi %16, %21 : vector<96x1xi1>
    %cst_10 = arith.constant 0.000000e+00 : f32
    %23 = vector.shape_cast %22 : vector<96x1xi1> to vector<96x1xi1>
    %24 = vector.broadcast %23 : vector<96x1xi1> to vector<96x128xi1>
    %25 = vector.broadcast %cst_10 : f32 to vector<96x128xf32>
    %26 = arith.select %24, %10, %25 : vector<96x128xi1>, vector<96x128xf32>
    %c16_i32_11 = arith.constant 16 : i32
    %c0_i32_12 = arith.constant 0 : i32
    %27 = arith.cmpi eq, %c16_i32_11, %c0_i32_12 : i32
    %c1_i32 = arith.constant 1 : i32
    %28 = arith.select %27, %c1_i32, %c16_i32_11 : i32
    %29 = vector.broadcast %28 : i32 to vector<96x1xi32>
    %30 = arith.remsi %11, %29 : vector<96x1xi32>
    %c0_i32_13 = arith.constant 0 : i32
    %31 = vector.broadcast %c0_i32_13 : i32 to vector<96x1xi32>
    %32 = arith.cmpi ne, %30, %31 : vector<96x1xi32>
    %c0_i32_14 = arith.constant 0 : i32
    %33 = vector.broadcast %c0_i32_14 : i32 to vector<96x1xi32>
    %34 = arith.cmpi slt, %30, %33 : vector<96x1xi32>
    %c0_i32_15 = arith.constant 0 : i32
    %35 = arith.cmpi slt, %28, %c0_i32_15 : i32
    %36 = vector.broadcast %35 : i1 to vector<96x1xi1>
    %37 = vector.broadcast %36 : vector<96x1xi1> to vector<96x1xi1>
    %38 = arith.xori %34, %37 : vector<96x1xi1>
    %39 = arith.andi %38, %32 : vector<96x1xi1>
    %40 = vector.broadcast %28 : i32 to vector<96x1xi32>
    %41 = arith.addi %30, %40 : vector<96x1xi32>
    %42 = arith.select %39, %41, %30 : vector<96x1xi1>, vector<96x1xi32>
    %c0_i32_16 = arith.constant 0 : i32
    %43 = vector.broadcast %c0_i32_16 : i32 to vector<96x1xi32>
    %44 = arith.cmpi sgt, %42, %43 : vector<96x1xi32>
    %c1_i32_17 = arith.constant 1 : i32
    %45 = tpu.dynamic_rotate %26 by %c1_i32_17 dim 0 : vector<96x128xf32>, i32 -> vector<96x128xf32>
    %cst_18 = arith.constant 0.000000e+00 : f32
    %46 = vector.shape_cast %44 : vector<96x1xi1> to vector<96x1xi1>
    %47 = vector.broadcast %46 : vector<96x1xi1> to vector<96x128xi1>
    %48 = vector.broadcast %cst_18 : f32 to vector<96x128xf32>
    %49 = arith.select %47, %45, %48 : vector<96x128xi1>, vector<96x128xf32>
    %c15_i32 = arith.constant 15 : i32
    %50 = vector.broadcast %c15_i32 : i32 to vector<96x1xi32>
    %51 = arith.cmpi slt, %42, %50 : vector<96x1xi32>
    %c95_i32 = arith.constant 95 : i32
    %52 = tpu.dynamic_rotate %26 by %c95_i32 dim 0 : vector<96x128xf32>, i32 -> vector<96x128xf32>
    %cst_19 = arith.constant 0.000000e+00 : f32
    %53 = vector.shape_cast %51 : vector<96x1xi1> to vector<96x1xi1>
    %54 = vector.broadcast %53 : vector<96x1xi1> to vector<96x128xi1>
    %55 = vector.broadcast %cst_19 : f32 to vector<96x128xf32>
    %56 = arith.select %54, %52, %55 : vector<96x128xi1>, vector<96x128xf32>
    %c0_20 = arith.constant 0 : index
    %c0_21 = arith.constant 0 : index
    %57 = vector.load %arg14[%c0_20, %c0_21] : memref<96x384xf32, #tpu.memory_space<vmem>>, vector<96x128xf32>
    tpu.vector_store %arg14[%c0_20, %c0_21], %49 {strides = array<i32>} : memref<96x384xf32, #tpu.memory_space<vmem>>, vector<96x128xf32>,
    %c0_22 = arith.constant 0 : index
    %c128 = arith.constant 128 : index
    %58 = vector.load %arg14[%c0_22, %c128] : memref<96x384xf32, #tpu.memory_space<vmem>>, vector<96x128xf32>
    tpu.vector_store %arg14[%c0_22, %c128], %26 {strides = array<i32>} : memref<96x384xf32, #tpu.memory_space<vmem>>, vector<96x128xf32>,
    %c0_23 = arith.constant 0 : index
    %c256 = arith.constant 256 : index
    %59 = vector.load %arg14[%c0_23, %c256] : memref<96x384xf32, #tpu.memory_space<vmem>>, vector<96x128xf32>
    tpu.vector_store %arg14[%c0_23, %c256], %56 {strides = array<i32>} : memref<96x384xf32, #tpu.memory_space<vmem>>, vector<96x128xf32>,
    %cst_24 = arith.constant 0.000000e+00 : f32
    %60 = vector.broadcast %cst_24 : f32 to vector<64x128xf32>
    %c0_25 = arith.constant 0 : index
    %c0_26 = arith.constant 0 : index
    %61 = vector.load %arg14[%c0_25, %c0_26] : memref<96x384xf32, #tpu.memory_space<vmem>>, vector<64x384xf32>
    %c0_27 = arith.constant 0 : index
    %c0_28 = arith.constant 0 : index
    %c0_29 = arith.constant 0 : index
    %62 = vector.load %arg6[%c0_27, %c0_28, %c0_29] : memref<3x384x128xf32, #tpu.memory_space<vmem>>, vector<1x384x128xf32>
    %63 = vector.shape_cast %62 : vector<1x384x128xf32> to vector<384x128xf32>
    %cst_30 = arith.constant dense<0.000000e+00> : vector<64x128xf32>
    %64 = tpu.matmul %61, %63, %cst_30 {dimension_numbers = #tpu.dot_dimension_numbers<[1], [0], [0], [1], [0, 0, 1, 1], [], []>} : vector<64x384xf32>, vector<384x128xf32>, vector<64x128xf32> -> vector<64x128xf32>
    %65 = arith.addf %60, %64 : vector<64x128xf32>
    %c16 = arith.constant 16 : index
    %c0_31 = arith.constant 0 : index
    %66 = vector.load %arg14[%c16, %c0_31] : memref<96x384xf32, #tpu.memory_space<vmem>>, vector<64x384xf32>
    %c1 = arith.constant 1 : index
    %c0_32 = arith.constant 0 : index
    %c0_33 = arith.constant 0 : index
    %67 = vector.load %arg6[%c1, %c0_32, %c0_33] : memref<3x384x128xf32, #tpu.memory_space<vmem>>, vector<1x384x128xf32>
    %68 = vector.shape_cast %67 : vector<1x384x128xf32> to vector<384x128xf32>
    %cst_34 = arith.constant dense<0.000000e+00> : vector<64x128xf32>
    %69 = tpu.matmul %66, %68, %cst_34 {dimension_numbers = #tpu.dot_dimension_numbers<[1], [0], [0], [1], [0, 0, 1, 1], [], []>} : vector<64x384xf32>, vector<384x128xf32>, vector<64x128xf32> -> vector<64x128xf32>
    %70 = arith.addf %65, %69 : vector<64x128xf32>
    %c32 = arith.constant 32 : index
    %c0_35 = arith.constant 0 : index
    %71 = vector.load %arg14[%c32, %c0_35] : memref<96x384xf32, #tpu.memory_space<vmem>>, vector<64x384xf32>
    %c2 = arith.constant 2 : index
    %c0_36 = arith.constant 0 : index
    %c0_37 = arith.constant 0 : index
    %72 = vector.load %arg6[%c2, %c0_36, %c0_37] : memref<3x384x128xf32, #tpu.memory_space<vmem>>, vector<1x384x128xf32>
    %73 = vector.shape_cast %72 : vector<1x384x128xf32> to vector<384x128xf32>
    %cst_38 = arith.constant dense<0.000000e+00> : vector<64x128xf32>
    %74 = tpu.matmul %71, %73, %cst_38 {dimension_numbers = #tpu.dot_dimension_numbers<[1], [0], [0], [1], [0, 0, 1, 1], [], []>} : vector<64x384xf32>, vector<384x128xf32>, vector<64x128xf32> -> vector<64x128xf32>
    %75 = arith.addf %70, %74 : vector<64x128xf32>
    %c0_39 = arith.constant 0 : index
    %c0_40 = arith.constant 0 : index
    %76 = vector.load %arg9[%c0_39, %c0_40] : memref<1x128xf32, #tpu.memory_space<vmem>>, vector<1x128xf32>
    %77 = vector.broadcast %76 : vector<1x128xf32> to vector<64x128xf32>
    %78 = arith.addf %75, %77 : vector<64x128xf32>
    %cst_41 = arith.constant 0.000000e+00 : f32
    %79 = vector.broadcast %cst_41 : f32 to vector<64x128xf32>
    %80 = arith.maximumf %78, %79 : vector<64x128xf32>
    %c0_42 = arith.constant 0 : index
    %c0_43 = arith.constant 0 : index
    %81 = vector.load %arg7[%c0_42, %c0_43] : memref<128x128xf32, #tpu.memory_space<vmem>>, vector<128x128xf32>
    %cst_44 = arith.constant dense<0.000000e+00> : vector<64x128xf32>
    %82 = tpu.matmul %80, %81, %cst_44 {dimension_numbers = #tpu.dot_dimension_numbers<[1], [0], [0], [1], [0, 0, 1, 1], [], []>} : vector<64x128xf32>, vector<128x128xf32>, vector<64x128xf32> -> vector<64x128xf32>
    %c0_45 = arith.constant 0 : index
    %c0_46 = arith.constant 0 : index
    %83 = vector.load %arg11[%c0_45, %c0_46] : memref<4x128xf32, #tpu.memory_space<vmem>>, vector<4x128xf32>
    %cst_47 = arith.constant dense<0.000000e+00> : vector<64x128xf32>
    %84 = tpu.matmul %0, %83, %cst_47 {dimension_numbers = #tpu.dot_dimension_numbers<[1], [0], [0], [1], [0, 0, 1, 1], [], []>} : vector<64x4xf32>, vector<4x128xf32>, vector<64x128xf32> -> vector<64x128xf32>
    %c0_48 = arith.constant 0 : index
    %c0_49 = arith.constant 0 : index
    %85 = vector.load %arg12[%c0_48, %c0_49] : memref<1x128xf32, #tpu.memory_space<vmem>>, vector<1x128xf32>
    %86 = vector.broadcast %85 : vector<1x128xf32> to vector<64x128xf32>
    %87 = arith.addf %84, %86 : vector<64x128xf32>
    %c0_50 = arith.constant 0 : index
    %c0_51 = arith.constant 0 : index
    %88 = vector.load %arg10[%c0_50, %c0_51] : memref<1x128xf32, #tpu.memory_space<vmem>>, vector<1x128xf32>
    %89 = vector.broadcast %88 : vector<1x128xf32> to vector<64x128xf32>
    %90 = arith.addf %82, %89 : vector<64x128xf32>
    %91 = arith.addf %90, %87 : vector<64x128xf32>
    %cst_52 = arith.constant 0.000000e+00 : f32
    %92 = vector.broadcast %cst_52 : f32 to vector<64x128xf32>
    %93 = arith.maximumf %91, %92 : vector<64x128xf32>
    %c0_53 = arith.constant 0 : index
    %c0_54 = arith.constant 0 : index
    %94 = vector.load %arg13[%c0_53, %c0_54] : memref<64x128xf32, #tpu.memory_space<vmem>>, vector<64x128xf32>
    tpu.vector_store %arg13[%c0_53, %c0_54], %93 {strides = array<i32>} : memref<64x128xf32, #tpu.memory_space<vmem>>, vector<64x128xf32>,
    return
  }
  func.func @transform_0(%arg0: i32, %arg1: i32) -> (i32, i32) {
    %c4_i32 = arith.constant 4 : i32
    %0 = arith.muli %arg0, %c4_i32 : i32
    %1 = arith.addi %0, %arg1 : i32
    %c0_i32 = arith.constant 0 : i32
    %c0_i32_0 = arith.constant 0 : i32
    return %1, %c0_i32 : i32, i32
  }
  func.func @transform_1(%arg0: i32, %arg1: i32) -> (i32, i32) {
    %c16_i32 = arith.constant 16 : i32
    %0 = arith.muli %arg0, %c16_i32 : i32
    %c4_i32 = arith.constant 4 : i32
    %1 = arith.muli %arg1, %c4_i32 : i32
    %c1_i32 = arith.constant 1 : i32
    %2 = arith.subi %1, %c1_i32 : i32
    %c0_i32 = arith.constant 0 : i32
    %3 = arith.maxsi %2, %c0_i32 : i32
    %4 = arith.addi %0, %3 : i32
    %c0_i32_0 = arith.constant 0 : i32
    %c0_i32_1 = arith.constant 0 : i32
    return %4, %c0_i32_0 : i32, i32
  }
  func.func @transform_2(%arg0: i32, %arg1: i32) -> (i32, i32) {
    %c16_i32 = arith.constant 16 : i32
    %0 = arith.muli %arg0, %c16_i32 : i32
    %c1_i32 = arith.constant 1 : i32
    %1 = arith.addi %arg1, %c1_i32 : i32
    %c4_i32 = arith.constant 4 : i32
    %2 = arith.muli %1, %c4_i32 : i32
    %c15_i32 = arith.constant 15 : i32
    %3 = arith.minsi %2, %c15_i32 : i32
    %4 = arith.addi %0, %3 : i32
    %c0_i32 = arith.constant 0 : i32
    %c0_i32_0 = arith.constant 0 : i32
    return %4, %c0_i32 : i32, i32
  }
  func.func @transform_3(%arg0: i32, %arg1: i32) -> (i32, i32) {
    %c0_i32 = arith.constant 0 : i32
    %c0_i32_0 = arith.constant 0 : i32
    %c0_i32_1 = arith.constant 0 : i32
    return %c0_i32, %c0_i32_0 : i32, i32
  }
  func.func @transform_4(%arg0: i32, %arg1: i32) -> (i32, i32, i32) {
    %c0_i32 = arith.constant 0 : i32
    %c0_i32_0 = arith.constant 0 : i32
    %c0_i32_1 = arith.constant 0 : i32
    %c0_i32_2 = arith.constant 0 : i32
    return %c0_i32, %c0_i32_0, %c0_i32_1 : i32, i32, i32
  }
  func.func @transform_5(%arg0: i32, %arg1: i32) -> (i32, i32) {
    %c0_i32 = arith.constant 0 : i32
    %c0_i32_0 = arith.constant 0 : i32
    %c0_i32_1 = arith.constant 0 : i32
    return %c0_i32, %c0_i32_0 : i32, i32
  }
  func.func @transform_6(%arg0: i32, %arg1: i32) -> (i32, i32) {
    %c0_i32 = arith.constant 0 : i32
    %c0_i32_0 = arith.constant 0 : i32
    %c0_i32_1 = arith.constant 0 : i32
    return %c0_i32, %c0_i32_0 : i32, i32
  }
  func.func @transform_7(%arg0: i32, %arg1: i32) -> (i32, i32) {
    %c0_i32 = arith.constant 0 : i32
    %c0_i32_0 = arith.constant 0 : i32
    %c0_i32_1 = arith.constant 0 : i32
    return %c0_i32, %c0_i32_0 : i32, i32
  }
  func.func @transform_8(%arg0: i32, %arg1: i32) -> (i32, i32) {
    %c0_i32 = arith.constant 0 : i32
    %c0_i32_0 = arith.constant 0 : i32
    %c0_i32_1 = arith.constant 0 : i32
    return %c0_i32, %c0_i32_0 : i32, i32
  }
  func.func @transform_9(%arg0: i32, %arg1: i32) -> (i32, i32) {
    %c0_i32 = arith.constant 0 : i32
    %c0_i32_0 = arith.constant 0 : i32
    %c0_i32_1 = arith.constant 0 : i32
    return %c0_i32, %c0_i32_0 : i32, i32
  }
  func.func @transform_10(%arg0: i32, %arg1: i32) -> (i32, i32) {
    %c0_i32 = arith.constant 0 : i32
    %c0_i32_0 = arith.constant 0 : i32
    %c0_i32_1 = arith.constant 0 : i32
    return %c0_i32, %c0_i32_0 : i32, i32
  }
  func.func @transform_11(%arg0: i32, %arg1: i32) -> (i32, i32) {
    %c4_i32 = arith.constant 4 : i32
    %0 = arith.muli %arg0, %c4_i32 : i32
    %1 = arith.addi %0, %arg1 : i32
    %c0_i32 = arith.constant 0 : i32
    %c0_i32_0 = arith.constant 0 : i32
    return %1, %c0_i32 : i32, i32
  }
}

</mosaic_0001>

<bundles_post_ra>
// kernel: bottleneck_forward.1
= control target key start
LH: loop header
LB: loop body
LE: loop exit
PB: predicated region body
PF: predicated region fallthrough
CT: control target
= control target key end

     0   :  { %s3538_s17 = smov 0   ;;  %s3540_s18 = smov 0   ;;  %s4609_s0 = inlined_call_operand.vmem [shape: f32[512,4], index: 0, kind: input, shape index: {}, may-alias: {0,1,2}]   ;;  %s4610_s1 = inlined_call_operand.vmem [shape: f32[512,4], index: 1, kind: input, shape index: {}, may-alias: {0,1,2}]   ;;  %s4611_s2 = inlined_call_operand.vmem [shape: f32[512,4], index: 2, kind: input, shape index: {}, may-alias: {0,1,2}]   ;;  %s4612_s3 = inlined_call_operand.vmem [shape: f32[4,128], index: 3, kind: input, shape index: {}]   ;;  %s4613_s4 = inlined_call_operand.vmem [shape: f32[3,384,128], index: 4, kind: input, shape index: {}]   ;;  %s4614_s5 = inlined_call_operand.vmem [shape: f32[128,128], index: 5, kind: input, shape index: {}]   ;;  %s4615_s6 = inlined_call_operand.vmem [shape: f32[1,128], index: 6, kind: input, shape index: {}]   ;;  %s4616_s7 = inlined_call_operand.vmem [shape: f32[1,128], index: 7, kind: input, shape index: {}]   ;;  %s4617_s8 = inlined_call_operand.vmem [shape: f32[1,128], index: 8, kind: input, shape index: {}]   ;;  %s4618_s9 = inlined_call_operand.vmem [shape: f32[4,128], index: 9, kind: input, shape index: {}]   ;;  %s4619_s10 = inlined_call_operand.vmem [shape: f32[1,128], index: 10, kind: input, shape index: {}]   ;;  %s4620_s11 = inlined_call_operand.vmem [shape: f32[512,128], index: 11, kind: output, shape index: {}]  }
   0x1   :  { %4635 = sst [smem:[#allocation11_spill]] %s4612_s3  ;;  %s3542_s19 = smov 0  }
   0x2   :  { %s3544_s20 = smov 0   ;;  %s3546_s21 = smov 0  }
   0x3 LB: > { %s30_s22 = sadd.s32 1, %s3468_s19  ;;  %s33_s23 = sadd.s32 1, %s3472_s20  ;;  %s3476_s21 = sphi %s3546_s21, %s21_s21   ;;  %s3472_s20 = sphi %s3544_s20, %s4686_s20   ;;  %s3468_s19 = sphi %s3542_s19, %s4685_s19   ;;  %s3464_s18 = sphi %s3540_s18, %s4684_s18   ;;  %s3460_s17 = sphi %s3538_s17, %s4683_s17  }
   0x4   : > { %p31_p0 = scmp.ge.s32.totalorder %s30_s22, 4  ;;  %p2440_p1 = scmp.ge.s32.totalorder %s3476_s21, 1 }
   0x5   : > { %p432_p2 = scmp.lt.s32.totalorder %s3476_s21, 9 }
   0x6   : > { %s4688_s22 = smov (%p31_p0, %s30_s22), 0  ;;  %s4690_s23 = smov (!%p31_p0, %s33_s23), %s3472_s20 }
   0x7   : > { %p433_p3 = pnand %p2440_p1, %p432_p2  ;;  %p35_p4 = scmp.ge.s32.totalorder %s4690_s23, 2 }
   0x9   : > { %s4692_s23 = smov (%p35_p4, %s4690_s23), 0  ;;  %436 = sbr.rel (%p433_p3) target bundleno = 801 (0x321), region = 64 }
   0xa   : > { %4636 = sst [smem:[#allocation3_spill]] %s4692_s23 }
  0x10   : > { %s4637_s3 = sld [smem:[#allocation11_spill]]  ;;  %vm611_vm0 = vcmask 1043456   ;;  %s2445_s26 = sshll.u32 %s3460_s17, 2  ;;  %v2486_v1 = vld [vmem:[%s4613_s4 + $0x200] sm:$0xff]  ;;  %v2487_v2 = vld [vmem:[%s4613_s4 + $0x208] sm:$0xff]  ;;  %v2488_v6 = vld [vmem:[%s4613_s4 + $0x210] sm:$0xff] }
  0x11   : > { %s2446_s27 = sadd.s32 4294967295, %s2445_s26  ;;  %s2585_s28 = sadd.s32 4, %s2445_s26  ;;  %v2470_v3 = vld [vmem:[%s4613_s4 + $0x180] sm:$0xff]  ;;  %v3110_v4 = vpack.c.bf16 %v2487_v2, %v2486_v1  ;;  %v2471_v5 = vld [vmem:[%s4613_s4 + $0x188] sm:$0xff]  ;;  %v2489_v7 = vld [vmem:[%s4613_s4 + $0x218] sm:$0xff]  ;;  %vm574_vm1 = vcmask 31744  }
  0x12   : > { %p511_p5 = scmp.gt.s32.totalorder %s2446_s27, 0  ;;  %p529_p6 = scmp.lt.s32.totalorder %s2585_s28, 15  ;;  %v3112_v8 = vpack.c.bf16 %v2471_v5, %v2470_v3  ;;  %v3114_v9 = vpack.c.bf16 %v2489_v7, %v2488_v6  ;;  %v2502_v10 = vld [vmem:[%s4613_s4 + $0x280] sm:$0xff]  ;;  %v2503_v11 = vld [vmem:[%s4613_s4 + $0x288] sm:$0xff]  ;;  %v2472_v12 = vld [vmem:[%s4613_s4 + $0x190] sm:$0xff] }
  0x13   : > { %s2444_s12 = sshll.u32 %s3464_s18, 4  ;;  %s2441_s13 = sshll.u32 %s3464_s18, 2  ;;  %3111 = vmatprep.subr.bf16.mxu1 %v3110_v4  ;;  %v3142_v13 = vpack.c.bf16 %v2503_v11, %v2502_v10  ;;  %v2473_v14 = vld [vmem:[%s4613_s4 + $0x198] sm:$0xff]  ;;  %v2490_v15 = vld [vmem:[%s4613_s4 + $0x220] sm:$0xff]  ;;  %v2491_v16 = vld [vmem:[%s4613_s4 + $0x228] sm:$0xff] }
  0x14   : > { %s4694_s27 = smov (!%p511_p5, %s2446_s27), 0  ;;  %s4696_s28 = smov (!%p529_p6, %s2585_s28), 15  ;;  %3113 = vmatpush3.bf16.msra.mxu1 %v3112_v8  ;;  %v3116_v17 = vpack.c.bf16 %v2473_v14, %v2472_v12  ;;  %v3118_v18 = vpack.c.bf16 %v2491_v16, %v2490_v15  ;;  %v2474_v19 = vld [vmem:[%s4613_s4 + $0x1a0] sm:$0xff]  ;;  %v2475_v20 = vld [vmem:[%s4613_s4 + $0x1a8] sm:$0xff]  ;;  %v2492_v21 = vld [vmem:[%s4613_s4 + $0x230] sm:$0xff] }
  0x15   : > { %s3618_s16 = sadd.s32 %s3460_s17, %s2441_s13  ;;  %3115 = vmatprep.subr.bf16.mxu1 %v3114_v9  ;;  %v2493_v22 = vld [vmem:[%s4613_s4 + $0x238] sm:$0xff]  ;;  %s3632_s15 = sadd.s32 %s2444_s12, %s4696_s28  ;;  %v3120_v23 = vpack.c.bf16 %v2475_v20, %v2474_v19  ;;  %v2504_v24 = vld [vmem:[%s4613_s4 + $0x290] sm:$0xff]  ;;  %v2494_v29 = vld [vmem:[%s4613_s4 + $0x240] sm:$0xff] }
  0x16   : > { %v566_v0 = vld [vmem:[%s4637_s3] sm:$0xf]  ;;  %s513_s3 = sadd.s32 %s2444_s12, %s4694_s27  ;;  %s2442_s23 = sshll.u32 %s3618_s16, 3  ;;  %v3122_v25 = vpack.c.bf16 %v2493_v22, %v2492_v21  ;;  %v2476_v26 = vld [vmem:[%s4613_s4 + $0x1b0] sm:$0xff]  ;;  %v2477_v27 = vld [vmem:[%s4613_s4 + $0x1b8] sm:$0xff] }
  0x17   : > { %2900 = vmatprep.subr.msk.mxu0 %vm611_vm0, %v566_v0  ;;  %s2447_s29 = sshll.u32 %s513_s3, 1  ;;  %p501_p8 = scmp.lt.s32.totalorder %s2442_s23, 63  ;;  %v2505_v28 = vld [vmem:[%s4613_s4 + $0x298] sm:$0xff]  ;;  %v2495_v30 = vld [vmem:[%s4613_s4 + $0x248] sm:$0xff]  ;;  %v3124_v31 = vpack.c.bf16 %v2477_v27, %v2476_v26  ;;  %v2506_v35 = vld [vmem:[%s4613_s4 + $0x2a0] sm:$0xff]  ;;  %v752_v27 = vlaneseq }
  0x18   : > { %2901 = vmatpush3.msk.msra.mxu0 %vm611_vm0, %v566_v0  ;;  %p515_p7 = scmp.lt.s32.totalorder %s2447_s29, 63  ;;  %3117 = vmatpush3.bf16.msra.mxu1 %v3116_v17  ;;  %s2451_s18 = sshll.u32 %s3632_s15, 1  ;;  %v3146_v34 = vpack.c.bf16 %v2505_v28, %v2504_v24  ;;  %v3126_v36 = vpack.c.bf16 %v2495_v30, %v2494_v29  ;;  %v2507_v37 = vld [vmem:[%s4613_s4 + $0x2a8] sm:$0xff]  ;;  %v2478_v38 = vld [vmem:[%s4613_s4 + $0x1c0] sm:$0xff]  ;;  %v2508_v45 = vld [vmem:[%s4613_s4 + $0x2b0] sm:$0xff] }
  0x19   : > { %3143 = vmatprep.subr.bf16.mxu0 %v3142_v13  ;;  %3119 = vmatprep.subr.bf16.mxu1 %v3118_v18  ;;  %s4700_s23 = smov (!%p501_p8, %s2442_s23), 63  ;;  %v2479_v39 = vld [vmem:[%s4613_s4 + $0x1c8] sm:$0xff]  ;;  %p3674_p9 = scmp.lt.s32.totalorder %s2451_s18, 63  ;;  %v3150_v43 = vpack.c.bf16 %v2507_v37, %v2506_v35  ;;  %v2509_v46 = vld [vmem:[%s4613_s4 + $0x2b8] sm:$0xff]  ;;  %v2510_v55 = vld [vmem:[%s4613_s4 + $0x2c0] sm:$0xff]  ;;  %v3818_v28 = vshrl.u32 %v752_v27, 7 }
  0x1a   : > { %s4698_s29 = smov (!%p515_p7, %s2447_s29), 63  ;;  %s2443_s25 = sshll.u32 %s4700_s23, 3  ;;  %v3128_v44 = vpack.c.bf16 %v2479_v39, %v2478_v38  ;;  %v3154_v49 = vpack.c.bf16 %v2509_v46, %v2508_v45  ;;  %v2511_v56 = vld [vmem:[%s4613_s4 + $0x2c8] sm:$0xff]  ;;  %v2496_v57 = vld [vmem:[%s4613_s4 + $0x250] sm:$0xff]  ;;  %v2497_v58 = vld [vmem:[%s4613_s4 + $0x258] sm:$0xff] }
  0x1b   : > { %s2448_s24 = sshll.u32 %s4698_s29, 3  ;;  %s3685_s30 = scalar_lea.vmem %s4609_s0, %s2443_s25  ;;  %v3158_v59 = vpack.c.bf16 %v2511_v56, %v2510_v55  ;;  %v3130_v60 = vpack.c.bf16 %v2497_v58, %v2496_v57  ;;  %v2480_v61 = vld [vmem:[%s4613_s4 + $0x1d0] sm:$0xff]  ;;  %v2481_v62 = vld [vmem:[%s4613_s4 + $0x1d8] sm:$0xff]  ;;  %v2498_v2 = vld [vmem:[%s4613_s4 + $0x260] sm:$0xff]  ;;  %v755_v29 = vadd.s32 16, %v3818_v28  ;;  %vm1037_vm3 = vcmp.lt.s32.totalorder %v3818_v28, 1 }
  0x1c   : > { %s518_s26 = scalar_lea.vmem %s4610_s1, %s2448_s24  ;;  %3121 = vmatpush3.bf16.msra.mxu1 %v3120_v23  ;;  %v3688_v40 = vld [vmem:[%s3685_s30] sm:$0xff]  ;;  %v3691_v41 = vld [vmem:[%s3685_s30 + $0x8] sm:$0xff]  ;;  %v3694_v42 = vld [vmem:[%s3685_s30 + $0x10] sm:$0xff]  ;;  %s4702_s18 = smov (!%p3674_p9, %s2451_s18), 63  ;;  %v3132_v63 = vpack.c.bf16 %v2481_v62, %v2480_v61  ;;  %vm1110_vm4 = vcmp.lt.s32.totalorder %v3818_v28, 7 }
  0x1d   : > { %v562_v32 = vld [vmem:[%s518_s26] sm:$0xff]  ;;  %v563_v33 = vld [vmem:[%s518_s26 + $0x8] sm:$0xff]  ;;  %3123 = vmatprep.subr.bf16.mxu1 %v3122_v25  ;;  %4639 = vst [vmem:[#allocation4_spill] sm:$0xff] %v3691_v41  ;;  %4640 = vst [vmem:[#allocation5_spill] sm:$0xff] %v3694_v42  ;;  %s2452_s14 = sshll.u32 %s4702_s18, 3  ;;  %p777_p10 = scmp.gt.s32.totalorder %s3460_s17, 0 }
  0x1e   : > { %2902 = vmatprep.mubr.msk.f32.mxu0 %vm574_vm1, %v562_v32  ;;  %v3713_v47 = vld [vmem:[%s3685_s30 + $0x18] sm:$0xff]  ;;  %v3716_v48 = vld [vmem:[%s3685_s30 + $0x20] sm:$0xff]  ;;  %v3723_v50 = vld [vmem:[%s3685_s30 + $0x28] sm:$0xff]  ;;  %s536_s13 = scalar_lea.vmem %s4611_s2, %s2452_s14  ;;  %p805_p11 = scmp.lt.s32.totalorder %s3460_s17, 3 }
  0x1f   : > { %2903 = vmatmul.mubr.msk.f32.vlgmr.msra.gmra.mrb[0].mxu0 %vm574_vm1, %v563_v33  ;;  %4641 = vst [vmem:[#allocation6_spill] sm:$0xff] %v3713_v47  ;;  %4642 = vst [vmem:[#allocation7_spill] sm:$0xff] %v3716_v48  ;;  %v3726_v51 = vld [vmem:[%s3685_s30 + $0x30] sm:$0xff]  ;;  %v3736_v52 = vld [vmem:[%s3685_s30 + $0x38] sm:$0xff]  ;;  %s778_s14 = scalar_select %p777_p10, 1, 0 }
  0x20   : > { %3145 = vmatpush3.bf16.msra.mxu0 %v3142_v13  ;;  %3125 = vmatpush3.bf16.msra.mxu1 %v3124_v31  ;;  %4643 = vst [vmem:[#allocation8_spill] sm:$0xff] %v3723_v50  ;;  %4644 = vst [vmem:[#allocation9_spill] sm:$0xff] %v3726_v51  ;;  %v564_v53 = vld [vmem:[%s536_s13] sm:$0xff]  ;;  %v565_v54 = vld [vmem:[%s536_s13 + $0x8] sm:$0xff]  ;;  %v887_v33 = vand.u32 15, %v755_v29  ;;  %s550_s26 = scalar_lea.vmem %s4620_s11, %s2443_s25 }
  0x21   : > { %3147 = vmatprep.subr.bf16.mxu0 %v3146_v34  ;;  %3127 = vmatprep.subr.bf16.mxu1 %v3126_v36  ;;  %4645 = vst [vmem:[#allocation10_spill] sm:$0xff] %v3736_v52  ;;  %v2512_v0 = vld [vmem:[%s4613_s4 + $0x2d0] sm:$0xff]  ;;  %v2513_v1 = vld [vmem:[%s4613_s4 + $0x2d8] sm:$0xff]  ;;  %v2499_v3 = vld [vmem:[%s4613_s4 + $0x268] sm:$0xff]  ;;  %v779_v31 = vstv %s778_s14  ;;  %s3982_s15 = scalar_select %p805_p11, 1, 0 }
  0x22   : > { %2905 = vmatprep.mubr.msk.f32.mxu0 %vm574_vm1, %v3688_v40  ;;  %v3162_v4 = vpack.c.bf16 %v2513_v1, %v2512_v0  ;;  %v3134_v5 = vpack.c.bf16 %v2499_v3, %v2498_v2  ;;  %v2482_v6 = vld [vmem:[%s4613_s4 + $0x1e0] sm:$0xff]  ;;  %v2483_v7 = vld [vmem:[%s4613_s4 + $0x1e8] sm:$0xff]  ;;  %v2500_v11 = vld [vmem:[%s4613_s4 + $0x270] sm:$0xff]  ;;  %vm3840_vm2 = vcmp.eq.s32.totalorder %v779_v31, 1  ;;  %vm3862_vm5 = vcmp.gt.s32.totalorder %v887_v33, 0 }
  0x23   : > { %2906 = vmatmul.mubr.msk.f32.gmra.mrb[2].mxu0 %vm574_vm1, %v3691_v41  ;;  %v3136_v8 = vpack.c.bf16 %v2483_v7, %v2482_v6  ;;  %v2514_v9 = vld [vmem:[%s4613_s4 + $0x2e0] sm:$0xff]  ;;  %v2515_v10 = vld [vmem:[%s4613_s4 + $0x2e8] sm:$0xff]  ;;  %v2501_v12 = vld [vmem:[%s4613_s4 + $0x278] sm:$0xff]  ;;  %v758_v2 = vadd.s32 40, %v3818_v28 }
  0x24   : > { %2908 = vmatprep.mubr.msk.f32.mxu0 %vm574_vm1, %v3694_v42  ;;  %3149 = vmatpush3.bf16.msra.mxu0 %v3146_v34  ;;  %v3166_v13 = vpack.c.bf16 %v2515_v10, %v2514_v9  ;;  %v3138_v14 = vpack.c.bf16 %v2501_v12, %v2500_v11  ;;  %v2484_v15 = vld [vmem:[%s4613_s4 + $0x1f0] sm:$0xff]  ;;  %v2485_v16 = vld [vmem:[%s4613_s4 + $0x1f8] sm:$0xff]  ;;  %v1235_v21 = vld [vmem:[%s4613_s4 + $0x80] sm:$0xff]  ;;  %v756_v34 = vadd.s32 24, %v3818_v28 }
  0x25   : > { %3151 = vmatprep.subr.bf16.mxu0 %v3150_v43  ;;  %3129 = vmatpush3.bf16.msra.mxu1 %v3128_v44  ;;  %v3140_v17 = vpack.c.bf16 %v2485_v16, %v2484_v15  ;;  %v2516_v18 = vld [vmem:[%s4613_s4 + $0x2f0] sm:$0xff]  ;;  %v2517_v19 = vld [vmem:[%s4613_s4 + $0x2f8] sm:$0xff]  ;;  %v1236_v22 = vld [vmem:[%s4613_s4 + $0x88] sm:$0xff]  ;;  %v908_v33 = vand.u32 15, %v758_v2 }
  0x26   : > { %3131 = vmatprep.subr.bf16.mxu1 %v3130_v60  ;;  %v3170_v20 = vpack.c.bf16 %v2517_v19, %v2516_v18  ;;  %v3174_v23 = vpack.c.bf16 %v1236_v22, %v1235_v21  ;;  %v1251_v24 = vld [vmem:[%s4613_s4 + $0x100] sm:$0xff]  ;;  %v1252_v25 = vld [vmem:[%s4613_s4 + $0x108] sm:$0xff]  ;;  %v3850_v44 = vld [vmem:[%s4613_s4 + $0x90] sm:$0xff]  ;;  %v894_v57 = vand.u32 15, %v756_v34 }
  0x27   : > { %2909 = vmatmul.mubr.msk.f32.gmra.mrb[4].mxu0 %vm574_vm1, %v3713_v47  ;;  %v3814_v26 = vpack.c.bf16 %v1252_v25, %v1251_v24  ;;  %v3824_v30 = vld [vmem:[%s4615_s6] ss:$0 sm:$0xff]  ;;  %v3838_v38 = vld [vmem:[%s4613_s4 + $0x8] sm:$0xff]  ;;  %v3855_v45 = vld [vmem:[%s4613_s4 + $0x98] sm:$0xff]  ;;  %vm3997_vm8 = vcmp.lt.s32.totalorder %v908_v33, 15 }
  0x28   : > { %2911 = vmatprep.mubr.msk.f32.mxu0 %vm574_vm1, %v3716_v48  ;;  %3153 = vmatpush3.bf16.msra.mxu0 %v3150_v43  ;;  %v3833_v37 = vld [vmem:[%s4613_s4] sm:$0xff]  ;;  %v3871_v58 = vld [vmem:[%s4613_s4 + $0x10] sm:$0xff]  ;;  %v3178_v62 = vpack.c.bf16 %v3855_v45, %v3850_v44  ;;  %v1254_v1 = vld [vmem:[%s4613_s4 + $0x118] sm:$0xff]  ;;  %vm3905_vm6 = vcmp.lt.s32.totalorder %v894_v57, 15 }
  0x29   : > { %3155 = vmatprep.subr.bf16.mxu0 %v3154_v49  ;;  %3133 = vmatpush3.bf16.msra.mxu1 %v3132_v63  ;;  %v3176_v56 = vpack.c.bf16 %v3838_v38, %v3833_v37  ;;  %v3883_v63 = vld [vmem:[%s4613_s4 + $0x18] sm:$0xff]  ;;  %v1253_v0 = vld [vmem:[%s4613_s4 + $0x110] sm:$0xff]  ;;  %v3914_v15 = vld [vmem:[%s4613_s4 + $0xa0] sm:$0xff] }
  0x2a   : > { %3135 = vmatprep.subr.bf16.mxu1 %v3134_v5  ;;  %v3919_v16 = vld [vmem:[%s4613_s4 + $0xa8] sm:$0xff]  ;;  %v3968_v45 = vld [vmem:[%s4613_s4 + $0x20] sm:$0xff]  ;;  %v2544_v55 = vld [vmem:[%s4613_s4 + $0x3d0] sm:$0xff] }
  0x2b   : > { %2912 = vmatmul.mubr.msk.f32.gmra.mrb[6].mxu0 %vm574_vm1, %v3723_v50  ;;  %v3182_v31 = vpack.c.bf16 %v3919_v16, %v3914_v15  ;;  %v1261_v50 = vld [vmem:[%s4613_s4 + $0x150] sm:$0xff] }
  0x2c   : > { %2914 = vmatprep.mubr.msk.f32.mxu0 %vm574_vm1, %v3726_v51  ;;  %3157 = vmatpush3.bf16.msra.mxu0 %v3154_v49  ;;  %v757_v49 = vadd.s32 32, %v3818_v28  ;;  %v4677_v51 = vld [vmem:[#allocation6_spill] sm:$0xff] }
  0x2d   : > { %3159 = vmatprep.subr.bf16.mxu0 %v3158_v59  ;;  %3137 = vmatpush3.bf16.msra.mxu1 %v3136_v8 }
  0x2e   : > { %3139 = vmatprep.subr.bf16.mxu1 %v3138_v14  ;;  %v901_v10 = vand.u32 15, %v757_v49  ;;  %v3180_v14 = vpack.c.bf16 %v3883_v63, %v3871_v58  ;;  %v3973_v49 = vld [vmem:[%s4613_s4 + $0x28] sm:$0xff] }
  0x2f   : > { %2915 = vmatmul.mubr.msk.f32.gmra.mrb[8].mxu0 %vm574_vm1, %v3736_v52 }
  0x30   : > { %2917 = vmatprep.mubr.msk.f32.mxu0 %vm574_vm1, %v564_v53  ;;  %3161 = vmatpush3.bf16.msra.mxu0 %v3158_v59  ;;  %vm3947_vm7 = vcmp.gt.s32.totalorder %v901_v10, 0 }
  0x31   : > { %3163 = vmatprep.subr.bf16.mxu0 %v3162_v4  ;;  %3141 = vmatpush3.bf16.msra.mxu1 %v3140_v17  ;;  %v3921_v17 = vpack.c.bf16 %v1254_v1, %v1253_v0  ;;  %v760_v1 = vadd.s32 56, %v3818_v28 }
  0x32   : > { %3175 = vmatprep.subr.bf16.mxu1 %v3174_v23 }
  0x33   : > { %2918 = vmatmul.mubr.msk.f32.gmra.mrb[10].mxu0 %vm574_vm1, %v565_v54 }
  0x34   : > { %3165 = vmatpush3.bf16.msra.mxu0 %v3162_v4 }
  0x35   : > { %3167 = vmatprep.subr.bf16.mxu0 %v3166_v13 }
  0x38   : > { %3169 = vmatpush3.bf16.msra.mxu0 %v3166_v13  ;;  %v2527_v13 = vld [vmem:[%s4613_s4 + $0x348] sm:$0xff] }
  0x39   : > { %3171 = vmatprep.subr.bf16.mxu0 %v3170_v20 }
  0x3c   : > { %3173 = vmatpush3.bf16.msra.mxu0 %v3170_v20 }
  0x3d   : > { %3207 = vmatprep.subr.bf16.mxu0 %v3814_v26 }
  0xf2   : > { %v2904_v32 = vpop.f32.mrb[0].mxu0 }
  0xf3   : > { %v3828_v35 = vadd.f32 %v2904_v32, %v3824_v30  ;;  %v681_v36 = vpop.f32.mrb[1].mxu0 }
  0xf4   : > { %v3845_v43 = vadd.f32 %v3824_v30, %v681_v36 }
  0xf5   : > { %v4621_v46 = vmax.f32 %v3828_v35, 0.0 }
  0xf6   : > { %v4622_v53 = vmax.f32 %v3845_v43, 0.0  ;;  %v2907_v54 = vpop.f32.mrb[2].mxu0  ;;  %v4671_v41 = vmax.f32 %v3845_v43, 0.0  ;;  %v2539_v43 = vld [vmem:[%s4613_s4 + $0x3a8] sm:$0xff] }
  0xf7   : > { %v858_v59 = vsel %vm3840_vm2, %v4621_v46, 0.0  ;;  %v697_v60 = vadd.f32 %v2907_v54, %v3824_v30  ;;  %v691_v61 = vpop.f32.mrb[3].mxu0 }
  0xf8   : > { %v1026_v3 = vrot.slane %v858_v59, 7  ;;  %v1099_v4 = vrot.slane %v858_v59, 1  ;;  %v3896_v5 = vsel %vm3840_vm2, %v4622_v53, 0.0  ;;  %v692_v6 = vadd.f32 %v3824_v30, %v691_v61 }
  0xf9   : > { %v4626_v7 = vrot.slane %v3896_v5, 7  ;;  %v4624_v8 = vrot.slane %v3896_v5, 1  ;;  %v3901_v9 = vmax.f32 %v697_v60, 0.0 }
  0xfa   : > { %v3903_v11 = vmax.f32 %v692_v6, 0.0  ;;  %v2910_v12 = vpop.f32.mrb[4].mxu0  ;;  %v4007_v6 = vadd.s32 48, %v3818_v28 }
  0xfb   : > { %v707_v18 = vadd.f32 %v2910_v12, %v3824_v30  ;;  %v701_v19 = vpop.f32.mrb[5].mxu0  ;;  %v1101_v20 = vrot.slane %v3901_v9, 1  ;;  %v1028_v21 = vrot.slane %v3901_v9, 7  ;;  %v3931_v22 = vsel %vm1110_vm4, %v4624_v8, %v1099_v4  ;;  %v1228_v8 = vld [vmem:[%s4613_s4 + $0x48] sm:$0xff] }
  0xfc   : > { %v702_v23 = vadd.f32 %v3824_v30, %v701_v19  ;;  %1386 = vmatprep.mubr.f32.mxu1 %v3903_v11  ;;  %v1027_v24 = vrot.slane %v3903_v11, 7  ;;  %v1100_v25 = vrot.slane %v3903_v11, 1  ;;  %v3941_v27 = vsel %vm1037_vm3, %v4626_v7, %v1026_v3  ;;  %v1242_v19 = vld [vmem:[%s4613_s4 + $0xb8] sm:$0xff] }
  0xfd   : > { %v3943_v29 = vmax.f32 %v707_v18, 0.0  ;;  %v1241_v18 = vld [vmem:[%s4613_s4 + $0xb0] sm:$0xff] }
  0xfe   : > { %v3951_v34 = vmax.f32 %v702_v23, 0.0  ;;  %v2913_v36 = vpop.f32.mrb[6].mxu0  ;;  %v3955_v37 = vsel %vm1037_vm3, %v1026_v3, %v1027_v24  ;;  %v3959_v38 = vsel %vm1110_vm4, %v1100_v25, %v1101_v20  ;;  %v3963_v44 = vsel %vm1037_vm3, %v1027_v24, %v1028_v21  ;;  %v4676_v3 = vld [vmem:[#allocation5_spill] sm:$0xff] }
  0xff   : > { %v717_v54 = vadd.f32 %v2913_v36, %v3824_v30  ;;  %v711_v57 = vpop.f32.mrb[7].mxu0  ;;  %2586 = vmatmul.mubr.msk.f32.vlgmr.msra.gmra.mrb[0].mxu1 %vm3862_vm5, %v3955_v37  ;;  %2952 = vmatprep.mubr.f32.mxu0 %v3959_v38  ;;  %v1103_v58 = vrot.slane %v3943_v29, 1  ;;  %v1030_v59 = vrot.slane %v3943_v29, 7  ;;  %v3988_v60 = vsel %vm1110_vm4, %v1099_v4, %v1100_v25 }
 0x100   : > { %v712_v61 = vadd.f32 %v3824_v30, %v711_v57  ;;  %3177 = vmatpush3.bf16.msra.mxu1 %v3176_v56  ;;  %1391 = vmatprep.mubr.f32.mxu1 %v3901_v9  ;;  %v1102_v63 = vrot.slane %v3951_v34, 1  ;;  %v1029_v0 = vrot.slane %v3951_v34, 7  ;;  %v3184_v4 = vpack.c.bf16 %v3973_v49, %v3968_v45  ;;  %v1255_v56 = vld [vmem:[%s4613_s4 + $0x120] sm:$0xff] }
 0x101   : > { %v3995_v2 = vmax.f32 %v717_v54, 0.0  ;;  %3179 = vmatprep.subr.bf16.mxu1 %v3178_v62  ;;  %v807_v24 = vstv %s3982_s15  ;;  %v922_v49 = vand.u32 15, %v760_v1 }
 0x102   : > { %v4009_v10 = vmax.f32 %v712_v61, 0.0  ;;  %v2916_v12 = vpop.f32.mrb[8].mxu0  ;;  %v4013_v62 = vsel %vm1110_vm4, %v1101_v20, %v1102_v63  ;;  %v4017_v15 = vsel %vm1110_vm4, %v1102_v63, %v1103_v58  ;;  %v4021_v16 = vsel %vm1037_vm3, %v1028_v21, %v1029_v0  ;;  %v1256_v20 = vld [vmem:[%s4613_s4 + $0x128] sm:$0xff] }
 0x103   : > { %v727_v23 = vadd.f32 %v2916_v12, %v3824_v30  ;;  %1392 = vmatmul.mubr.f32.gmra.mrb[2].mxu1 %v3963_v44  ;;  %2953 = vmatmul.mubr.msk.f32.vlgmr.msra.gmra.mrb[12].mxu0 %vm3905_vm6, %v4013_v62  ;;  %v721_v21 = vpop.f32.mrb[9].mxu0  ;;  %v4040_v25 = vsel %vm1037_vm3, %v1029_v0, %v1030_v59  ;;  %v1105_v33 = vrot.slane %v3995_v2, 1  ;;  %v3186_v61 = vpack.c.bf16 %v1242_v19, %v1241_v18  ;;  %v1244_v19 = vld [vmem:[%s4613_s4 + $0xc8] sm:$0xff] }
 0x104   : > { %3181 = vmatpush3.bf16.msra.mxu1 %v3180_v14  ;;  %3209 = vmatpush3.bf16.msra.mxu0 %v3814_v26  ;;  %v722_v36 = vadd.f32 %v3824_v30, %v721_v21  ;;  %v1104_v45 = vrot.slane %v4009_v10, 1  ;;  %v4623_v54 = vrot.slane %v4009_v10, 7  ;;  %v3214_v63 = vpack.c.bf16 %v1256_v20, %v1255_v56  ;;  %v1225_v14 = vld [vmem:[%s4613_s4 + $0x30] sm:$0xff]  ;;  %v1226_v26 = vld [vmem:[%s4613_s4 + $0x38] sm:$0xff]  ;;  %v1243_v56 = vld [vmem:[%s4613_s4 + $0xc0] sm:$0xff] }
 0x105   : > { %v4047_v57 = vmax.f32 %v727_v23, 0.0  ;;  %1396 = vmatprep.mubr.f32.mxu1 %v3951_v34  ;;  %2955 = vmatprep.mubr.f32.mxu0 %v4017_v15  ;;  %v762_v0 = vadd.s32 72, %v3818_v28  ;;  %v915_v20 = vand.u32 15, %v4007_v6  ;;  %vm4081_vm9 = vcmp.eq.s32.totalorder %v807_v24, 1  ;;  %v1257_v6 = vld [vmem:[%s4613_s4 + $0x130] sm:$0xff]  ;;  %v1258_v24 = vld [vmem:[%s4613_s4 + $0x138] sm:$0xff] }
 0x106   : > { %v4058_v1 = vmax.f32 %v722_v36, 0.0  ;;  %v2919_v12 = vpop.f32.mrb[10].mxu0  ;;  %3183 = vmatprep.subr.bf16.mxu1 %v3182_v31  ;;  %3211 = vmatprep.subr.bf16.mxu0 %v3921_v17  ;;  %v4063_v18 = vsel %vm1110_vm4, %v1103_v58, %v1104_v45  ;;  %v4076_v31 = vsel %vm1037_vm3, %v1030_v59, %v4623_v54  ;;  %v4093_v59 = vsel %vm1110_vm4, %v1104_v45, %v1105_v33  ;;  %v1227_v54 = vld [vmem:[%s4613_s4 + $0x40] sm:$0xff]  ;;  %v2057_v58 = vld [vmem:[%s4614_s5 + $0x8] sm:$0xff] }
 0x107   : > { %v4079_v23 = vadd.f32 %v2919_v12, %v3824_v30  ;;  %v731_v21 = vpop.f32.mrb[11].mxu0  ;;  %2587 = vmatmul.mubr.msk.f32.gmra.mrb[4].mxu1 %vm3947_vm7, %v4021_v16  ;;  %2956 = vmatmul.mubr.msk.f32.gmra.mrb[14].mxu0 %vm3997_vm8, %v4063_v18  ;;  %v1107_v36 = vrot.slane %v4047_v57, 1  ;;  %v3188_v46 = vpack.c.bf16 %v1226_v26, %v1225_v14  ;;  %vm4106_vm10 = vcmp.lt.s32.totalorder %v922_v49, 15 }
 0x108   : > { %v4103_v12 = vadd.f32 %v3824_v30, %v731_v21  ;;  %3185 = vmatpush3.bf16.msra.mxu1 %v3184_v4  ;;  %3213 = vmatpush3.bf16.msra.mxu0 %v3921_v17  ;;  %v1106_v53 = vrot.slane %v4058_v1, 1  ;;  %v3190_v17 = vpack.c.bf16 %v1244_v19, %v1243_v56  ;;  %v936_v4 = vand.u32 15, %v762_v0  ;;  %v1260_v0 = vld [vmem:[%s4613_s4 + $0x148] sm:$0xff] }
 0x109   : > { %v4625_v30 = vmax.f32 %v4079_v23, 0.0  ;;  %1401 = vmatprep.mubr.f32.mxu1 %v3943_v29  ;;  %3187 = vmatprep.subr.bf16.mxu1 %v3186_v61  ;;  %v3218_v26 = vpack.c.bf16 %v1258_v24, %v1257_v6  ;;  %vm4125_vm11 = vcmp.gt.s32.totalorder %v915_v20, 0  ;;  %v1259_v61 = vld [vmem:[%s4613_s4 + $0x140] sm:$0xff]  ;;  %v3192_v19 = vpack.c.bf16 %v1228_v8, %v1227_v54  ;;  %v1245_v20 = vld [vmem:[%s4613_s4 + $0xd0] sm:$0xff]  ;;  %v1246_v6 = vld [vmem:[%s4613_s4 + $0xd8] sm:$0xff] }
 0x10a   : > { %v4629_v49 = vmax.f32 %v4103_v12, 0.0  ;;  %3215 = vmatprep.subr.bf16.mxu0 %v3214_v63  ;;  %2958 = vmatprep.mubr.f32.mxu0 %v4093_v59  ;;  %v4123_v14 = vsel %vm1110_vm4, %v1105_v33, %v1106_v53  ;;  %v4145_v33 = vsel %vm1110_vm4, %v1106_v53, %v1107_v36  ;;  %v761_v53 = vadd.s32 64, %v3818_v28 }
 0x10b   : > { %v868_v56 = vsel %vm4081_vm9, %v4625_v30, 0.0  ;;  %1402 = vmatmul.mubr.f32.gmra.mrb[6].mxu1 %v4040_v25  ;;  %2959 = vmatmul.mubr.msk.f32.gmra.mrb[16].mxu0 %vm4106_vm10, %v4123_v14  ;;  %vm4160_vm12 = vcmp.lt.s32.totalorder %v936_v4, 15  ;;  %v3222_v24 = vpack.c.bf16 %v1260_v0, %v1259_v61  ;;  %v1248_v4 = vld [vmem:[%s4613_s4 + $0xe8] sm:$0xff]  ;;  %v4664_v61 = vrot.slane %v3896_v5, 7 }
 0x10c   : > { %v1036_v30 = vrot.slane %v868_v56, 7  ;;  %v1109_v7 = vrot.slane %v868_v56, 1  ;;  %v867_v52 = vsel %vm4081_vm9, %v4629_v49, 0.0  ;;  %3189 = vmatpush3.bf16.msra.mxu1 %v3188_v46  ;;  %3217 = vmatpush3.bf16.msra.mxu0 %v3214_v63  ;;  %v1229_v56 = vld [vmem:[%s4613_s4 + $0x50] sm:$0xff]  ;;  %v1230_v46 = vld [vmem:[%s4613_s4 + $0x58] sm:$0xff]  ;;  %v1032_v63 = vrot.slane %v3995_v2, 7 }
 0x10d   : > { %v1035_v8 = vrot.slane %v867_v52, 7  ;;  %v1108_v54 = vrot.slane %v867_v52, 1  ;;  %1406 = vmatprep.mubr.f32.mxu1 %v4009_v10  ;;  %3191 = vmatprep.subr.bf16.mxu1 %v3190_v17  ;;  %v3194_v52 = vpack.c.bf16 %v1246_v6, %v1245_v20  ;;  %v1247_v17 = vld [vmem:[%s4613_s4 + $0xe0] sm:$0xff]  ;;  %v4665_v49 = vrot.slane %v3896_v5, 1  ;;  %v1262_v5 = vld [vmem:[%s4613_s4 + $0x158] sm:$0xff] }
 0x10e   : > { %3219 = vmatprep.subr.bf16.mxu0 %v3218_v26  ;;  %2961 = vmatprep.mubr.f32.mxu0 %v4145_v33  ;;  %v4182_v0 = vsel %vm1037_vm3, %v1036_v30, %v4664_v61  ;;  %v4666_v61 = vrot.slane %v4047_v57, 7  ;;  %v3196_v47 = vpack.c.bf16 %v1230_v46, %v1229_v56  ;;  %v929_v42 = vand.u32 15, %v761_v53  ;;  %v1250_v56 = vld [vmem:[%s4613_s4 + $0xf8] sm:$0xff] }
 0x10f   : > { %v4188_v20 = vsel %vm1110_vm4, %v1109_v7, %v4665_v49  ;;  %2588 = vmatmul.mubr.msk.f32.gmra.mrb[8].mxu1 %vm4125_vm11, %v4076_v31  ;;  %v4195_v6 = vsel %vm1110_vm4, %v1107_v36, %v1108_v54  ;;  %v4211_v48 = vsel %vm1037_vm3, %v1035_v8, %v1036_v30  ;;  %v4215_v36 = vsel %vm1110_vm4, %v1108_v54, %v1109_v7  ;;  %v1231_v30 = vld [vmem:[%s4613_s4 + $0x60] sm:$0xff]  ;;  %v1232_v7 = vld [vmem:[%s4613_s4 + $0x68] sm:$0xff]  ;;  %v1249_v54 = vld [vmem:[%s4613_s4 + $0xf0] sm:$0xff] }
 0x110   : > { %v4207_v49 = vsel %vm1037_vm3, %v4666_v61, %v1035_v8  ;;  %3193 = vmatpush3.bf16.msra.mxu1 %v3192_v19  ;;  %3221 = vmatpush3.bf16.msra.mxu0 %v3218_v26  ;;  %v3198_v61 = vpack.c.bf16 %v1248_v4, %v1247_v17  ;;  %v4667_v26 = vrot.slane %v4009_v10, 7  ;;  %v3226_v53 = vpack.c.bf16 %v1262_v5, %v1261_v50  ;;  %v1264_v50 = vld [vmem:[%s4613_s4 + $0x168] sm:$0xff]  ;;  %v1233_v4 = vld [vmem:[%s4613_s4 + $0x70] sm:$0xff]  ;;  %v1234_v5 = vld [vmem:[%s4613_s4 + $0x78] sm:$0xff] }
 0x111   : > { %1411 = vmatprep.mubr.f32.mxu1 %v3995_v2  ;;  %2962 = vmatmul.mubr.msk.f32.gmra.mrb[18].mxu0 %vm4160_vm12, %v4195_v6  ;;  %v1033_v8 = vrot.slane %v4058_v1, 7  ;;  %vm4248_vm13 = vcmp.gt.s32.totalorder %v929_v42, 0  ;;  %v3202_v17 = vpack.c.bf16 %v1250_v56, %v1249_v54  ;;  %v754_v54 = vadd.s32 8, %v3818_v28 }
 0x112   : > { %2996 = vmatprep.mubr.f32.mxu0 %v3931_v22  ;;  %3195 = vmatprep.subr.bf16.mxu1 %v3194_v52  ;;  %v4232_v19 = vsel %vm1037_vm3, %v4667_v26, %v1032_v63  ;;  %v1263_v22 = vld [vmem:[%s4613_s4 + $0x160] sm:$0xff]  ;;  %v3200_v52 = vpack.c.bf16 %v1232_v7, %v1231_v30  ;;  %v3204_v7 = vpack.c.bf16 %v1234_v5, %v1233_v4  ;;  %v873_v26 = vand.u32 15, %v3818_v28  ;;  %v2537_v5 = vld [vmem:[%s4613_s4 + $0x398] sm:$0xff] }
 0x113   : > { %3223 = vmatprep.subr.bf16.mxu0 %v3222_v24  ;;  %1412 = vmatmul.mubr.f32.gmra.mrb[10].mxu1 %v4232_v19  ;;  %v4261_v42 = vsel %vm1037_vm3, %v1032_v63, %v1033_v8  ;;  %v2534_v30 = vld [vmem:[%s4613_s4 + $0x380] sm:$0xff]  ;;  %v2535_v63 = vld [vmem:[%s4613_s4 + $0x388] sm:$0xff]  ;;  %v4673_v46 = vmax.f32 %v4103_v12, 0.0  ;;  %v764_v12 = vadd.s32 88, %v3818_v28 }
 0x114   : > { %3197 = vmatpush3.bf16.msra.mxu1 %v3196_v47  ;;  %3225 = vmatpush3.bf16.msra.mxu0 %v3222_v24  ;;  %v3230_v47 = vpack.c.bf16 %v1264_v50, %v1263_v22  ;;  %v1265_v24 = vld [vmem:[%s4613_s4 + $0x170] sm:$0xff]  ;;  %v2518_v22 = vld [vmem:[%s4613_s4 + $0x300] sm:$0xff]  ;;  %v2519_v50 = vld [vmem:[%s4613_s4 + $0x308] sm:$0xff]  ;;  %v3238_v4 = vpack.c.bf16 %v2535_v63, %v2534_v30  ;;  %vm1013_vm14 = vcmp.gt.s32.totalorder %v873_v26, 0 }
 0x115   : > { %1416 = vmatprep.mubr.f32.mxu1 %v4058_v1  ;;  %3199 = vmatprep.subr.bf16.mxu1 %v3198_v61  ;;  %v1266_v61 = vld [vmem:[%s4613_s4 + $0x178] sm:$0xff]  ;;  %v2520_v30 = vld [vmem:[%s4613_s4 + $0x310] sm:$0xff] }
 0x116   : > { %3227 = vmatprep.subr.bf16.mxu0 %v3226_v53  ;;  %v3234_v56 = vpack.c.bf16 %v1266_v61, %v1265_v24  ;;  %v3240_v24 = vpack.c.bf16 %v2519_v50, %v2518_v22  ;;  %v880_v61 = vand.u32 15, %v754_v54  ;;  %v2521_v63 = vld [vmem:[%s4613_s4 + $0x318] sm:$0xff]  ;;  %v2522_v54 = vld [vmem:[%s4613_s4 + $0x320] sm:$0xff]  ;;  %v2523_v22 = vld [vmem:[%s4613_s4 + $0x328] sm:$0xff] }
 0x117   : > { %2589 = vmatmul.mubr.msk.f32.gmra.mrb[12].mxu1 %vm4248_vm13, %v4261_v42  ;;  %v3248_v39 = vpack.c.bf16 %v2523_v22, %v2522_v54  ;;  %v2524_v50 = vld [vmem:[%s4613_s4 + $0x330] sm:$0xff]  ;;  %v2550_v54 = vld [vmem:[%s4613_s4 + $0x400] sm:$0xff]  ;;  %v2551_v22 = vld [vmem:[%s4613_s4 + $0x408] sm:$0xff] }
 0x118   : > { %3201 = vmatpush3.bf16.msra.mxu1 %v3200_v52  ;;  %3229 = vmatpush3.bf16.msra.mxu0 %v3226_v53  ;;  %v4670_v53 = vrot.slane %v4047_v57, 7  ;;  %vm1087_vm15 = vcmp.lt.s32.totalorder %v880_v61, 15 }
 0x119   : > { %1421 = vmatprep.mubr.f32.mxu1 %v4047_v57  ;;  %3203 = vmatprep.subr.bf16.mxu1 %v3202_v17  ;;  %v2536_v17 = vld [vmem:[%s4613_s4 + $0x390] sm:$0xff] }
 0x11a   : > { %3231 = vmatprep.subr.bf16.mxu0 %v3230_v47  ;;  %v4291_v52 = vsel %vm1037_vm3, %v1033_v8, %v4670_v53  ;;  %v3242_v8 = vpack.c.bf16 %v2537_v5, %v2536_v17  ;;  %v2525_v53 = vld [vmem:[%s4613_s4 + $0x338] sm:$0xff]  ;;  %v2528_v17 = vld [vmem:[%s4613_s4 + $0x350] sm:$0xff] }
 0x11b   : > { %1422 = vmatmul.mubr.f32.gmra.mrb[14].mxu1 %v4291_v52  ;;  %v2529_v5 = vld [vmem:[%s4613_s4 + $0x358] sm:$0xff] }
 0x11c   : > { %3205 = vmatpush3.bf16.msra.mxu1 %v3204_v7  ;;  %3233 = vmatpush3.bf16.msra.mxu0 %v3230_v47  ;;  %v2538_v47 = vld [vmem:[%s4613_s4 + $0x3a0] sm:$0xff]  ;;  %v4672_v7 = vmax.f32 %v3828_v35, 0.0  ;;  %v2541_v35 = vld [vmem:[%s4613_s4 + $0x3b8] sm:$0xff]  ;;  %v3260_v61 = vpack.c.bf16 %v2529_v5, %v2528_v17 }
 0x11d   : > { %2594 = vmatprep.mubr.msk.f32.mxu1 %vm3840_vm2, %v4671_v41  ;;  %3235 = vmatprep.subr.bf16.mxu0 %v3234_v56  ;;  %v3244_v41 = vpack.c.bf16 %v2521_v63, %v2520_v30  ;;  %v3246_v26 = vpack.c.bf16 %v2539_v43, %v2538_v47  ;;  %v2530_v30 = vld [vmem:[%s4613_s4 + $0x360] sm:$0xff]  ;;  %v2531_v63 = vld [vmem:[%s4613_s4 + $0x368] sm:$0xff]  ;;  %v2548_v47 = vld [vmem:[%s4613_s4 + $0x3f0] sm:$0xff] }
 0x11e   : > { %3239 = vmatprep.subr.bf16.mxu1 %v3238_v4  ;;  %v2526_v4 = vld [vmem:[%s4613_s4 + $0x340] sm:$0xff]  ;;  %v2549_v43 = vld [vmem:[%s4613_s4 + $0x3f8] sm:$0xff] }
 0x11f   : > { %2595 = vmatmul.mubr.msk.f32.vlgmr.msra.gmra.mrb[16].mxu1 %vm1013_vm14, %v4182_v0  ;;  %v2540_v0 = vld [vmem:[%s4613_s4 + $0x3b0] sm:$0xff]  ;;  %v2064_v5 = vld [vmem:[%s4614_s5 + $0x40] sm:$0xff] }
 0x120   : > { %3237 = vmatpush3.bf16.msra.mxu0 %v3234_v56  ;;  %3241 = vmatpush3.bf16.msra.mxu1 %v3240_v24  ;;  %v3250_v56 = vpack.c.bf16 %v2541_v35, %v2540_v0  ;;  %v2547_v24 = vld [vmem:[%s4613_s4 + $0x3e8] sm:$0xff]  ;;  %v3270_v35 = vpack.c.bf16 %v2551_v22, %v2550_v54 }
 0x121   : > { %2596 = vmatprep.mubr.msk.f32.mxu1 %vm3840_vm2, %v4672_v7  ;;  %3243 = vmatprep.subr.bf16.mxu1 %v3242_v8  ;;  %v3266_v7 = vpack.c.bf16 %v2549_v43, %v2548_v47  ;;  %v2069_v47 = vld [vmem:[%s4614_s5 + $0x68] sm:$0xff] }
 0x123   : > { %2997 = vmatmul.mubr.msk.f32.vlgmr.msra.gmra.mrb[12].mxu0 %vm1087_vm15, %v3988_v60  ;;  %1602 = vmatmul.mubr.f32.gmra.mrb[18].mxu1 %v3941_v27  ;;  %v2542_v27 = vld [vmem:[%s4613_s4 + $0x3c0] sm:$0xff] }
 0x124   : > { %2999 = vmatprep.mubr.f32.mxu0 %v3959_v38  ;;  %3245 = vmatpush3.bf16.msra.mxu1 %v3244_v41  ;;  %v2543_v38 = vld [vmem:[%s4613_s4 + $0x3c8] sm:$0xff]  ;;  %v3264_v41 = vpack.c.bf16 %v2531_v63, %v2530_v30  ;;  %v2068_v63 = vld [vmem:[%s4614_s5 + $0x60] sm:$0xff] }
 0x125   : > { %1606 = vmatprep.mubr.f32.mxu1 %v3903_v11  ;;  %3247 = vmatprep.subr.bf16.mxu1 %v3246_v26  ;;  %v3252_v11 = vpack.c.bf16 %v2525_v53, %v2524_v50  ;;  %v3254_v60 = vpack.c.bf16 %v2543_v38, %v2542_v27  ;;  %v2533_v26 = vld [vmem:[%s4613_s4 + $0x378] sm:$0xff]  ;;  %v2554_v53 = vld [vmem:[%s4613_s4 + $0x420] sm:$0xff]  ;;  %v2555_v27 = vld [vmem:[%s4613_s4 + $0x428] sm:$0xff]  ;;  %v3326_v43 = vpack.c.bf16 %v2069_v47, %v2068_v63 }
 0x126   : > { %v3278_v38 = vpack.c.bf16 %v2555_v27, %v2554_v53 }
 0x127   : > { %3000 = vmatmul.mubr.msk.f32.gmra.mrb[14].mxu0 %vm3905_vm6, %v4013_v62  ;;  %2597 = vmatmul.mubr.msk.f32.gmra.mrb[20].mxu1 %vm3862_vm5, %v3955_v37  ;;  %v2545_v37 = vld [vmem:[%s4613_s4 + $0x3d8] sm:$0xff] }
 0x128   : > { %3002 = vmatprep.mubr.f32.mxu0 %v4017_v15  ;;  %3249 = vmatpush3.bf16.msra.mxu1 %v3248_v39  ;;  %v3258_v62 = vpack.c.bf16 %v2545_v37, %v2544_v55  ;;  %v2552_v39 = vld [vmem:[%s4613_s4 + $0x410] sm:$0xff]  ;;  %v2565_v55 = vld [vmem:[%s4613_s4 + $0x478] sm:$0xff] }
 0x129   : > { %1611 = vmatprep.mubr.f32.mxu1 %v3901_v9  ;;  %3251 = vmatprep.subr.bf16.mxu1 %v3250_v56  ;;  %v3256_v9 = vpack.c.bf16 %v2527_v13, %v2526_v4  ;;  %v2553_v56 = vld [vmem:[%s4613_s4 + $0x418] sm:$0xff]  ;;  %v2563_v4 = vld [vmem:[%s4613_s4 + $0x468] sm:$0xff]  ;;  %v2564_v13 = vld [vmem:[%s4613_s4 + $0x470] sm:$0xff] }
 0x12a   : > { %v3274_v50 = vpack.c.bf16 %v2553_v56, %v2552_v39 }
 0x12b   : > { %3003 = vmatmul.mubr.msk.f32.gmra.mrb[16].mxu0 %vm3997_vm8, %v4063_v18  ;;  %1612 = vmatmul.mubr.f32.gmra.mrb[22].mxu1 %v3963_v44  ;;  %v2546_v44 = vld [vmem:[%s4613_s4 + $0x3e0] sm:$0xff] }
 0x12c   : > { %3005 = vmatprep.mubr.f32.mxu0 %v4093_v59  ;;  %3253 = vmatpush3.bf16.msra.mxu1 %v3252_v11  ;;  %v3262_v8 = vpack.c.bf16 %v2547_v24, %v2546_v44  ;;  %v2557_v11 = vld [vmem:[%s4613_s4 + $0x438] sm:$0xff]  ;;  %v2065_v44 = vld [vmem:[%s4614_s5 + $0x48] sm:$0xff] }
 0x12d   : > { %1616 = vmatprep.mubr.f32.mxu1 %v3951_v34  ;;  %3255 = vmatprep.subr.bf16.mxu1 %v3254_v60  ;;  %v2561_v60 = vld [vmem:[%s4613_s4 + $0x458] sm:$0xff]  ;;  %v3318_v24 = vpack.c.bf16 %v2065_v44, %v2064_v5 }
 0x12f   : > { %3006 = vmatmul.mubr.msk.f32.gmra.mrb[18].mxu0 %vm4106_vm10, %v4123_v14  ;;  %2598 = vmatmul.mubr.msk.f32.gmra.mrb[24].mxu1 %vm3947_vm7, %v4021_v16 }
 0x130   : > { %3257 = vmatpush3.bf16.msra.mxu1 %v3256_v9  ;;  %1621 = vmatprep.mubr.f32.mxu1 %v3943_v29  ;;  %v2062_v9 = vld [vmem:[%s4614_s5 + $0x30] sm:$0xff] }
 0x131   : > { %3259 = vmatprep.subr.bf16.mxu1 %v3258_v62  ;;  %3054 = vmatprep.mubr.msk.f32.mxu0 %vm574_vm1, %v3688_v40  ;;  %v2532_v40 = vld [vmem:[%s4613_s4 + $0x370] sm:$0xff]  ;;  %v2063_v62 = vld [vmem:[%s4614_s5 + $0x38] sm:$0xff] }
 0x132   : > { %v3268_v0 = vpack.c.bf16 %v2533_v26, %v2532_v40  ;;  %v3314_v17 = vpack.c.bf16 %v2063_v62, %v2062_v9 }
 0x133   : > { %1622 = vmatmul.mubr.f32.gmra.mrb[26].mxu1 %v4040_v25 }
 0x134   : > { %3261 = vmatpush3.bf16.msra.mxu1 %v3260_v61  ;;  %1626 = vmatprep.mubr.f32.mxu1 %v4009_v10  ;;  %v2066_v61 = vld [vmem:[%s4614_s5 + $0x50] sm:$0xff] }
 0x135   : > { %3263 = vmatprep.subr.bf16.mxu1 %v3262_v8  ;;  %v2067_v8 = vld [vmem:[%s4614_s5 + $0x58] sm:$0xff] }
 0x136   : > { %v3322_v30 = vpack.c.bf16 %v2067_v8, %v2066_v61 }
 0x137   : > { %2599 = vmatmul.mubr.msk.f32.gmra.mrb[28].mxu1 %vm4125_vm11, %v4076_v31 }
 0x138   : > { %3265 = vmatpush3.bf16.msra.mxu1 %v3264_v41  ;;  %1631 = vmatprep.mubr.f32.mxu1 %v3995_v2  ;;  %v2070_v41 = vld [vmem:[%s4614_s5 + $0x70] sm:$0xff] }
 0x139   : > { %3267 = vmatprep.subr.bf16.mxu1 %v3266_v7  ;;  %v2071_v7 = vld [vmem:[%s4614_s5 + $0x78] sm:$0xff] }
 0x13a   : > { %v3330_v40 = vpack.c.bf16 %v2071_v7, %v2070_v41 }
 0x13b   : > { %1632 = vmatmul.mubr.f32.gmra.mrb[30].mxu1 %v4232_v19 }
 0x13c   : > { %3269 = vmatpush3.bf16.msra.mxu1 %v3268_v0  ;;  %1879 = vmatprep.mubr.f32.mxu1 %v3951_v34  ;;  %v2556_v34 = vld [vmem:[%s4613_s4 + $0x430] sm:$0xff] }
 0x13d   : > { %3271 = vmatprep.subr.bf16.mxu1 %v3270_v35  ;;  %v3282_v32 = vpack.c.bf16 %v2557_v11, %v2556_v34 }
 0x13f   : > { %2604 = vmatmul.mubr.msk.f32.vlgmr.msra.gmra.mrb[32].mxu1 %vm3947_vm7, %v4021_v16  ;;  %v2559_v16 = vld [vmem:[%s4613_s4 + $0x448] sm:$0xff] }
 0x140   : > { %3273 = vmatpush3.bf16.msra.mxu1 %v3270_v35  ;;  %1884 = vmatprep.mubr.f32.mxu1 %v3943_v29  ;;  %v2558_v29 = vld [vmem:[%s4613_s4 + $0x440] sm:$0xff] }
 0x141   : > { %3275 = vmatprep.subr.bf16.mxu1 %v3274_v50 }
 0x143   : > { %1885 = vmatmul.mubr.f32.gmra.mrb[34].mxu1 %v4040_v25  ;;  %v3286_v25 = vpack.c.bf16 %v2559_v16, %v2558_v29 }
 0x144   : > { %3277 = vmatpush3.bf16.msra.mxu1 %v3274_v50  ;;  %1889 = vmatprep.mubr.f32.mxu1 %v4009_v10  ;;  %v2560_v10 = vld [vmem:[%s4613_s4 + $0x450] sm:$0xff] }
 0x145   : > { %3279 = vmatprep.subr.bf16.mxu1 %v3278_v38  ;;  %v3290_v21 = vpack.c.bf16 %v2561_v60, %v2560_v10 }
 0x147   : > { %2605 = vmatmul.mubr.msk.f32.gmra.mrb[36].mxu1 %vm4125_vm11, %v4076_v31  ;;  %v763_v31 = vadd.s32 80, %v3818_v28  ;;  %v4675_v28 = vld [vmem:[#allocation4_spill] sm:$0xff] }
 0x148   : > { %3281 = vmatpush3.bf16.msra.mxu1 %v3278_v38  ;;  %1894 = vmatprep.mubr.f32.mxu1 %v3995_v2  ;;  %v2562_v2 = vld [vmem:[%s4613_s4 + $0x460] sm:$0xff] }
 0x149   : > { %3283 = vmatprep.subr.bf16.mxu1 %v3282_v32 }
 0x14b   : > { %1895 = vmatmul.mubr.f32.gmra.mrb[38].mxu1 %v4232_v19  ;;  %v3294_v19 = vpack.c.bf16 %v2563_v4, %v2562_v2 }
 0x14c   : > { %3285 = vmatpush3.bf16.msra.mxu1 %v3282_v32  ;;  %1899 = vmatprep.mubr.f32.mxu1 %v4058_v1  ;;  %v943_v1 = vand.u32 15, %v763_v31 }
 0x14d   : > { %3287 = vmatprep.subr.bf16.mxu1 %v3286_v25 }
 0x14e   : > { %vm1023_vm2 = vcmp.gt.s32.totalorder %v943_v1, 0 }
 0x14f   : > { %2606 = vmatmul.mubr.msk.f32.gmra.mrb[40].mxu1 %vm4248_vm13, %v4261_v42  ;;  %v4674_v42 = vmax.f32 %v4079_v23, 0.0  ;;  %v950_v23 = vand.u32 15, %v764_v12 }
 0x150   : > { %3289 = vmatpush3.bf16.msra.mxu1 %v3286_v25  ;;  %1904 = vmatprep.mubr.f32.mxu1 %v4047_v57  ;;  %v3298_v57 = vpack.c.bf16 %v2565_v55, %v2564_v13 }
 0x151   : > { %3291 = vmatprep.subr.bf16.mxu1 %v3290_v21  ;;  %vm1097_vm3 = vcmp.lt.s32.totalorder %v950_v23, 15 }
 0x153   : > { %1905 = vmatmul.mubr.f32.gmra.mrb[42].mxu1 %v4291_v52  ;;  %v2061_v52 = vld [vmem:[%s4614_s5 + $0x28] sm:$0xff] }
 0x154   : > { %3293 = vmatpush3.bf16.msra.mxu1 %v3290_v21  ;;  %2607 = vmatprep.mubr.msk.f32.mxu1 %vm4081_vm9, %v4673_v46 }
 0x155   : > { %3295 = vmatprep.subr.bf16.mxu1 %v3294_v19 }
 0x157   : > { %2608 = vmatmul.mubr.msk.f32.gmra.mrb[44].mxu1 %vm1023_vm2, %v4207_v49  ;;  %v4681_v49 = vld [vmem:[#allocation10_spill] sm:$0xff] }
 0x158   : > { %3297 = vmatpush3.bf16.msra.mxu1 %v3294_v19  ;;  %2609 = vmatprep.mubr.msk.f32.mxu1 %vm4081_vm9, %v4674_v42 }
 0x159   : > { %3299 = vmatprep.subr.bf16.mxu1 %v3298_v57 }
 0x15b   : > { %1915 = vmatmul.mubr.f32.gmra.mrb[46].mxu1 %v4211_v48  ;;  %v2072_v48 = vld [vmem:[%s4618_s9] sm:$0xf] }
 0x15c   : > { %3301 = vmatpush3.bf16.msra.mxu1 %v3298_v57  ;;  %3040 = vmatprep.mubr.f32.mxu1 %v4017_v15  ;;  %v4678_v15 = vld [vmem:[#allocation7_spill] sm:$0xff] }
 0x15d   : > { %3052 = vmatprep.subr.msk.mxu0 %vm611_vm0, %v2072_v48 }
 0x15e   : > { %3053 = vmatpush3.msk.msra.mxu0 %vm611_vm0, %v2072_v48 }
 0x15f   : > { %3041 = vmatmul.mubr.msk.f32.vlgmr.msra.gmra.mrb[48].mxu1 %vm3997_vm8, %v4063_v18  ;;  %3055 = vmatmul.mubr.msk.f32.vlgmr.msra.gmra.mrb[20].mxu0 %vm574_vm1, %v4675_v28  ;;  %v2056_v18 = vld [vmem:[%s4614_s5] sm:$0xff] }
 0x160   : > { %3043 = vmatprep.mubr.f32.mxu1 %v4093_v59  ;;  %3057 = vmatprep.mubr.msk.f32.mxu0 %vm574_vm1, %v4676_v3  ;;  %v4679_v59 = vld [vmem:[#allocation8_spill] sm:$0xff]  ;;  %v3302_v45 = vpack.c.bf16 %v2057_v58, %v2056_v18 }
 0x162   : > { %3303 = vmatprep.subr.bf16.mxu0 %v3302_v45 }
 0x163   : > { %3044 = vmatmul.mubr.msk.f32.gmra.mrb[50].mxu1 %vm4106_vm10, %v4123_v14  ;;  %3058 = vmatmul.mubr.msk.f32.gmra.mrb[22].mxu0 %vm574_vm1, %v4677_v51  ;;  %v4680_v14 = vld [vmem:[#allocation9_spill] sm:$0xff] }
 0x164   : > { %3046 = vmatprep.mubr.f32.mxu1 %v4145_v33  ;;  %3060 = vmatprep.mubr.msk.f32.mxu0 %vm574_vm1, %v4678_v15  ;;  %v2058_v33 = vld [vmem:[%s4614_s5 + $0x10] sm:$0xff] }
 0x165   : > { %3305 = vmatpush3.bf16.msra.mxu0 %v3302_v45 }
 0x167   : > { %3047 = vmatmul.mubr.msk.f32.gmra.mrb[52].mxu1 %vm4160_vm12, %v4195_v6  ;;  %3061 = vmatmul.mubr.msk.f32.gmra.mrb[24].mxu0 %vm574_vm1, %v4679_v59 }
 0x168   : > { %3049 = vmatprep.mubr.f32.mxu1 %v4215_v36  ;;  %3063 = vmatprep.mubr.msk.f32.mxu0 %vm574_vm1, %v4680_v14  ;;  %v2060_v36 = vld [vmem:[%s4614_s5 + $0x20] sm:$0xff] }
 0x169   : > { %v3310_v37 = vpack.c.bf16 %v2061_v52, %v2060_v36 }
 0x16b   : > { %3050 = vmatmul.mubr.msk.f32.gmra.mrb[54].mxu1 %vm1097_vm3, %v4188_v20  ;;  %v2059_v20 = vld [vmem:[%s4614_s5 + $0x18] sm:$0xff]  ;;  %3064 = vmatmul.mubr.msk.f32.gmra.mrb[26].mxu0 %vm574_vm1, %v4681_v49 }
 0x16c   : > { %v3306_v6 = vpack.c.bf16 %v2059_v20, %v2058_v33 }
 0x16e   : > { %3307 = vmatprep.subr.bf16.mxu0 %v3306_v6 }
 0x16f   : > { %3309 = vmatpush3.bf16.msra.mxu0 %v3306_v6 }
 0x170   : > { %3311 = vmatprep.subr.bf16.mxu0 %v3310_v37 }
 0x173   : > { %3313 = vmatpush3.bf16.msra.mxu0 %v3310_v37 }
 0x174   : > { %3315 = vmatprep.subr.bf16.mxu0 %v3314_v17 }
 0x177   : > { %3317 = vmatpush3.bf16.msra.mxu0 %v3314_v17 }
 0x178   : > { %3319 = vmatprep.subr.bf16.mxu0 %v3318_v24 }
 0x17b   : > { %3321 = vmatpush3.bf16.msra.mxu0 %v3318_v24 }
 0x17c   : > { %3323 = vmatprep.subr.bf16.mxu0 %v3322_v30 }
 0x17f   : > { %3325 = vmatpush3.bf16.msra.mxu0 %v3322_v30 }
 0x180   : > { %3327 = vmatprep.subr.bf16.mxu0 %v3326_v43 }
 0x183   : > { %3329 = vmatpush3.bf16.msra.mxu0 %v3326_v43 }
 0x184   : > { %3331 = vmatprep.subr.bf16.mxu0 %v3330_v40 }
 0x187   : > { %3333 = vmatpush3.bf16.msra.mxu0 %v3330_v40 }
 0x1d2   : > { %v2659_v26 = vpop.f32.mrb[0].mxu1 }
 0x1d3   : > { %v2660_v54 = vpop.f32.mrb[1].mxu1 }
 0x1d4   : > { %v2661_v22 = vadd.f32 %v2660_v54, %v2659_v26 }
 0x1d6   : > { %v2662_v0 = vpop.f32.mrb[2].mxu1 }
 0x1d7   : > { %v2663_v35 = vpop.f32.mrb[3].mxu1 }
 0x1d8   : > { %v2664_v39 = vadd.f32 %v2663_v35, %v2662_v0 }
 0x1da   : > { %v2665_v56 = vpop.f32.mrb[4].mxu1 }
 0x1db   : > { %v2666_v50 = vpop.f32.mrb[5].mxu1 }
 0x1dc   : > { %v2667_v53 = vadd.f32 %v2666_v50, %v2665_v56 }
 0x1de   : > { %v2668_v27 = vpop.f32.mrb[6].mxu1 }
 0x1df   : > { %v2669_v38 = vpop.f32.mrb[7].mxu1 }
 0x1e0   : > { %v2670_v34 = vadd.f32 %v2669_v38, %v2668_v27 }
 0x1e2   : > { %v2671_v11 = vpop.f32.mrb[8].mxu1 }
 0x1e3   : > { %v2672_v32 = vpop.f32.mrb[9].mxu1 }
 0x1e4   : > { %v2673_v29 = vadd.f32 %v2672_v32, %v2671_v11 }
 0x1e6   : > { %v2674_v16 = vpop.f32.mrb[10].mxu1 }
 0x1e7   : > { %v2675_v25 = vpop.f32.mrb[11].mxu1 }
 0x1e8   : > { %v2676_v10 = vadd.f32 %v2675_v25, %v2674_v16 }
 0x1ea   : > { %v2677_v60 = vpop.f32.mrb[12].mxu1 }
 0x1eb   : > { %v2678_v31 = vpop.f32.mrb[13].mxu1 }
 0x1ec   : > { %v2679_v21 = vadd.f32 %v2678_v31, %v2677_v60 }
 0x1ee   : > { %v2680_v2 = vpop.f32.mrb[14].mxu1 }
 0x1ef   : > { %v2681_v4 = vpop.f32.mrb[15].mxu1 }
 0x1f0   : > { %v2682_v1 = vadd.f32 %v2681_v4, %v2680_v2 }
 0x1f2   : > { %v2739_v19 = vpop.f32.mrb[16].mxu1 }
 0x1f3   : > { %v2740_v13 = vpop.f32.mrb[17].mxu1 }
 0x1f4   : > { %v2741_v55 = vadd.f32 %v2740_v13, %v2739_v19 }
 0x1f6   : > { %v2998_v46 = vpop.f32.mrb[12].mxu0  ;;  %v2742_v57 = vpop.f32.mrb[18].mxu1  ;;  %v3338_v42 = vadd.f32 %v2741_v55, %v2661_v22 }
 0x1f7   : > { %v1703_v12 = vpop.f32.mrb[13].mxu0  ;;  %v2743_v23 = vpop.f32.mrb[19].mxu1 }
 0x1f8   : > { %v3339_v48 = vadd.f32 %v3338_v42, %v1703_v12  ;;  %v2744_v28 = vadd.f32 %v2743_v23, %v2742_v57 }
 0x1fa   : > { %v3334_v3 = vadd.f32 %v2744_v28, %v2664_v39  ;;  %v3001_v51 = vpop.f32.mrb[14].mxu0  ;;  %v2745_v15 = vpop.f32.mrb[20].mxu1 }
 0x1fb   : > { %v1713_v18 = vpop.f32.mrb[15].mxu0  ;;  %v2746_v58 = vpop.f32.mrb[21].mxu1 }
 0x1fc   : > { %v2747_v59 = vadd.f32 %v2746_v58, %v2745_v15  ;;  %v3335_v45 = vadd.f32 %v3334_v3, %v2998_v46 }
 0x1fe   : > { %v3346_v14 = vadd.f32 %v2747_v59, %v2667_v53  ;;  %v3004_v33 = vpop.f32.mrb[16].mxu0  ;;  %v2748_v20 = vpop.f32.mrb[22].mxu1 }
 0x1ff   : > { %v1723_v6 = vpop.f32.mrb[17].mxu0  ;;  %v2749_v49 = vpop.f32.mrb[23].mxu1 }
 0x200   : > { %v2750_v36 = vadd.f32 %v2749_v49, %v2748_v20  ;;  %v3347_v52 = vadd.f32 %v3346_v14, %v1713_v18 }
 0x202   : > { %v3342_v37 = vadd.f32 %v2750_v36, %v2670_v34  ;;  %v3007_v9 = vpop.f32.mrb[18].mxu0  ;;  %v2751_v62 = vpop.f32.mrb[24].mxu1 }
 0x203   : > { %v1733_v17 = vpop.f32.mrb[19].mxu0  ;;  %v2752_v5 = vpop.f32.mrb[25].mxu1 }
 0x204   : > { %v2753_v44 = vadd.f32 %v2752_v5, %v2751_v62  ;;  %v3343_v24 = vadd.f32 %v3342_v37, %v3001_v51 }
 0x206   : > { %v3354_v61 = vadd.f32 %v2753_v44, %v2673_v29  ;;  %v2754_v8 = vpop.f32.mrb[26].mxu1 }
 0x207   : > { %v2755_v30 = vpop.f32.mrb[27].mxu1 }
 0x208   : > { %v2756_v63 = vadd.f32 %v2755_v30, %v2754_v8  ;;  %v3355_v47 = vadd.f32 %v3354_v61, %v1723_v6 }
 0x20a   : > { %v3350_v43 = vadd.f32 %v2756_v63, %v2676_v10  ;;  %v2757_v41 = vpop.f32.mrb[28].mxu1 }
 0x20b   : > { %v2758_v7 = vpop.f32.mrb[29].mxu1 }
 0x20c   : > { %v2759_v40 = vadd.f32 %v2758_v7, %v2757_v41  ;;  %v3351_v26 = vadd.f32 %v3350_v43, %v3004_v33 }
 0x20e   : > { %v3362_v54 = vadd.f32 %v2759_v40, %v2679_v21  ;;  %v2760_v22 = vpop.f32.mrb[30].mxu1 }
 0x20f   : > { %v2761_v0 = vpop.f32.mrb[31].mxu1 }
 0x210   : > { %v2762_v35 = vadd.f32 %v2761_v0, %v2760_v22  ;;  %v3363_v39 = vadd.f32 %v3362_v54, %v1733_v17 }
 0x212   : > { %v3358_v56 = vadd.f32 %v2762_v35, %v2682_v1  ;;  %v2819_v50 = vpop.f32.mrb[32].mxu1 }
 0x213   : > { %v2820_v53 = vpop.f32.mrb[33].mxu1 }
 0x214   : > { %v2821_v27 = vadd.f32 %v2820_v53, %v2819_v50  ;;  %v3359_v38 = vadd.f32 %v3358_v56, %v3007_v9 }
 0x216   : > { %v2822_v34 = vpop.f32.mrb[34].mxu1  ;;  %v3340_v11 = vadd.f32 %v3339_v48, %v2821_v27  ;;  %v2567_v27 = vld [vmem:[%s4619_s10] ss:$0 sm:$0xff] }
 0x217   : > { %v2823_v32 = vpop.f32.mrb[35].mxu1 }
 0x218   : > { %v2824_v29 = vadd.f32 %v2823_v32, %v2822_v34 }
 0x21a   : > { %v2825_v16 = vpop.f32.mrb[36].mxu1  ;;  %v3336_v25 = vadd.f32 %v3335_v45, %v2824_v29  ;;  %v2566_v45 = vld [vmem:[%s4616_s7] ss:$0 sm:$0xff] }
 0x21b   : > { %v2826_v10 = vpop.f32.mrb[37].mxu1 }
 0x21c   : > { %v2827_v60 = vadd.f32 %v2826_v10, %v2825_v16 }
 0x21e   : > { %v2828_v31 = vpop.f32.mrb[38].mxu1  ;;  %v3348_v2 = vadd.f32 %v3347_v52, %v2827_v60 }
 0x21f   : > { %v2829_v21 = vpop.f32.mrb[39].mxu1 }
 0x220   : > { %v2830_v4 = vadd.f32 %v2829_v21, %v2828_v31 }
 0x222   : > { %v2831_v19 = vpop.f32.mrb[40].mxu1  ;;  %v3344_v13 = vadd.f32 %v3343_v24, %v2830_v4 }
 0x223   : > { %v2832_v55 = vpop.f32.mrb[41].mxu1 }
 0x224   : > { %v2833_v1 = vadd.f32 %v2832_v55, %v2831_v19 }
 0x226   : > { %v2834_v46 = vpop.f32.mrb[42].mxu1  ;;  %v3356_v57 = vadd.f32 %v3355_v47, %v2833_v1 }
 0x227   : > { %v2835_v42 = vpop.f32.mrb[43].mxu1 }
 0x228   : > { %v2836_v12 = vadd.f32 %v2835_v42, %v2834_v46 }
 0x22a   : > { %v2837_v23 = vpop.f32.mrb[44].mxu1  ;;  %v3352_v48 = vadd.f32 %v3351_v26, %v2836_v12 }
 0x22b   : > { %v2838_v28 = vpop.f32.mrb[45].mxu1 }
 0x22c   : > { %v2839_v3 = vadd.f32 %v2838_v28, %v2837_v23 }
 0x22e   : > { %v2840_v51 = vpop.f32.mrb[46].mxu1  ;;  %v3364_v15 = vadd.f32 %v3363_v39, %v2839_v3 }
 0x22f   : > { %v2841_v18 = vpop.f32.mrb[47].mxu1 }
 0x230   : > { %v2842_v58 = vadd.f32 %v2841_v18, %v2840_v51 }
 0x232   : > { %v3042_v59 = vpop.f32.mrb[48].mxu1  ;;  %v3360_v14 = vadd.f32 %v3359_v38, %v2842_v58  ;;  %v2577_v38 = vld [vmem:[%s4617_s8] ss:$0 sm:$0xff] }
 0x233   : > { %v3337_v33 = vadd.f32 %v3336_v25, %v3042_v59  ;;  %v1986_v20 = vpop.f32.mrb[49].mxu1  ;;  %v3372_v32 = vadd.f32 %v2577_v38, %v2567_v27 }
 0x234   : > { %v3341_v6 = vadd.f32 %v3340_v11, %v1986_v20 }
 0x235   : > { %v2041_v49 = vadd.f32 %v3337_v33, %v2566_v45 }
 0x236   : > { %v2040_v36 = vadd.f32 %v3341_v6, %v2566_v45  ;;  %v3045_v52 = vpop.f32.mrb[50].mxu1 }
 0x237   : > { %v3345_v37 = vadd.f32 %v3344_v13, %v3045_v52  ;;  %v1996_v9 = vpop.f32.mrb[51].mxu1  ;;  %v2049_v5 = vmax.f32 %v2041_v49, 0.0 }
 0x238   : > { %v2048_v62 = vmax.f32 %v2040_v36, 0.0  ;;  %v3349_v17 = vadd.f32 %v3348_v2, %v1996_v9 }
 0x239   : > { %v2043_v44 = vadd.f32 %v3345_v37, %v2566_v45 }
 0x23a   : > { %v2042_v24 = vadd.f32 %v3349_v17, %v2566_v45  ;;  %v3048_v61 = vpop.f32.mrb[52].mxu1  ;;  %3098 = vmatprep.mubr.f32.mxu0 %v2048_v62 }
 0x23b   : > { %v3353_v8 = vadd.f32 %v3352_v48, %v3048_v61  ;;  %v2006_v30 = vpop.f32.mrb[53].mxu1  ;;  %3099 = vmatmul.mubr.f32.vlgmr.msra.gmra.mrb[20].mxu0 %v2049_v5  ;;  %v2051_v43 = vmax.f32 %v2043_v44, 0.0 }
 0x23c   : > { %v2050_v63 = vmax.f32 %v2042_v24, 0.0  ;;  %v3357_v47 = vadd.f32 %v3356_v57, %v2006_v30 }
 0x23d   : > { %v2045_v41 = vadd.f32 %v3353_v8, %v2566_v45 }
 0x23e   : > { %v2044_v7 = vadd.f32 %v3357_v47, %v2566_v45  ;;  %v3051_v40 = vpop.f32.mrb[54].mxu1  ;;  %3101 = vmatprep.mubr.f32.mxu0 %v2050_v63 }
 0x23f   : > { %v3361_v26 = vadd.f32 %v3360_v14, %v3051_v40  ;;  %v2016_v54 = vpop.f32.mrb[55].mxu1  ;;  %3102 = vmatmul.mubr.f32.gmra.mrb[22].mxu0 %v2051_v43  ;;  %v2053_v35 = vmax.f32 %v2045_v41, 0.0 }
 0x240   : > { %v2052_v22 = vmax.f32 %v2044_v7, 0.0  ;;  %v3365_v0 = vadd.f32 %v3364_v15, %v2016_v54 }
 0x241   : > { %v2047_v39 = vadd.f32 %v3361_v26, %v2566_v45 }
 0x242   : > { %v2046_v56 = vadd.f32 %v3365_v0, %v2566_v45  ;;  %3104 = vmatprep.mubr.f32.mxu0 %v2052_v22 }
 0x243   : > { %3105 = vmatmul.mubr.f32.gmra.mrb[24].mxu0 %v2053_v35  ;;  %v2055_v53 = vmax.f32 %v2047_v39, 0.0 }
 0x244   : > { %v2054_v50 = vmax.f32 %v2046_v56, 0.0 }
 0x246   : > { %3107 = vmatprep.mubr.f32.mxu0 %v2054_v50 }
 0x247   : > { %3108 = vmatmul.mubr.f32.gmra.mrb[26].mxu0 %v2055_v53 }
 0x30e   : > { %v3100_v34 = vpop.f32.mrb[20].mxu0 }
 0x30f   : > { %v3366_v11 = vadd.f32 %v3100_v34, %v2567_v27  ;;  %v2261_v29 = vpop.f32.mrb[21].mxu0 }
 0x310   : > { %v3368_v16 = vadd.f32 %v2567_v27, %v2261_v29 }
 0x311   : > { %v3367_v25 = vadd.f32 %v3366_v11, %v2577_v38 }
 0x312   : > { %v3369_v10 = vadd.f32 %v3368_v16, %v2577_v38  ;;  %v3103_v60 = vpop.f32.mrb[22].mxu0 }
 0x313   : > { %v2309_v31 = vmax.f32 %v3367_v25, 0.0  ;;  %v3371_v2 = vadd.f32 %v3372_v32, %v3103_v60  ;;  %v2271_v21 = vpop.f32.mrb[23].mxu0 }
 0x314   : > { %v2308_v4 = vmax.f32 %v3369_v10, 0.0  ;;  %v3373_v19 = vadd.f32 %v3372_v32, %v2271_v21 }
 0x315   : > { %2317 = vst [vmem:[%s550_s26 + $0x8] sm:$0xff] %v2309_v31  ;;  %v2311_v13 = vmax.f32 %v3371_v2, 0.0 }
 0x316   : > { %2316 = vst [vmem:[%s550_s26] sm:$0xff] %v2308_v4  ;;  %v2310_v55 = vmax.f32 %v3373_v19, 0.0  ;;  %v3106_v1 = vpop.f32.mrb[24].mxu0 }
 0x317   : > { %2319 = vst [vmem:[%s550_s26 + $0x18] sm:$0xff] %v2311_v13  ;;  %v3375_v46 = vadd.f32 %v3372_v32, %v3106_v1  ;;  %v2281_v57 = vpop.f32.mrb[25].mxu0 }
 0x318   : > { %2318 = vst [vmem:[%s550_s26 + $0x10] sm:$0xff] %v2310_v55  ;;  %v3377_v42 = vadd.f32 %v3372_v32, %v2281_v57 }
 0x319   : > { %v2313_v12 = vmax.f32 %v3375_v46, 0.0 }
 0x31a   : > { %v2312_v23 = vmax.f32 %v3377_v42, 0.0  ;;  %v3109_v48 = vpop.f32.mrb[26].mxu0 }
 0x31b   : > { %2321 = vst [vmem:[%s550_s26 + $0x28] sm:$0xff] %v2313_v12  ;;  %v3379_v28 = vadd.f32 %v3372_v32, %v3109_v48  ;;  %v2291_v3 = vpop.f32.mrb[27].mxu0 }
 0x31c   : > { %2320 = vst [vmem:[%s550_s26 + $0x20] sm:$0xff] %v2312_v23  ;;  %v3381_v51 = vadd.f32 %v3372_v32, %v2291_v3 }
 0x31d   : > { %v2315_v15 = vmax.f32 %v3379_v28, 0.0 }
 0x31e   : > { %v2314_v18 = vmax.f32 %v3381_v51, 0.0 }
 0x31f   : > { %2323 = vst [vmem:[%s550_s26 + $0x38] sm:$0xff] %v2315_v15 }
 0x320   : > { %2322 = vst [vmem:[%s550_s26 + $0x30] sm:$0xff] %v2314_v18 }
 0x321 PF: > { %s21_s21 = sadd.s32 1, %s3476_s21   ;;  %s4682_s23 = sld [smem:[#allocation3_spill]] }
 0x322   : > { %p18_p12 = scmp.ge.s32.totalorder %s21_s21, 10   ;;  %s4683_s17 = smov %s3468_s19 }
 0x323   : > { %s4684_s18 = smov %s3472_s20  ;;  %s4685_s19 = smov %s4688_s22 }
 0x324   :  { %20 = sbr.rel (!%p18_p12) target bundleno = 3 (0x3), region = 102 }
 0x327   : > { %s4686_s20 = smov %s4682_s23 }

</bundles_post_ra>
